<compile_context>
chip_gen: v7x
topology: tpu7x:2x2x1
jax: 0.10.0
libtpu: 0.0.40
codegen_flags: <defaults>
</compile_context>

<pallas_src>
import functools

import jax
import jax.numpy as jnp
from jax.experimental import pallas as pl
from jax.experimental.pallas import tpu as pltpu

DROP_P = 0.1


def _add_softmax_dropout_kernel(seed_ref, x_ref, bias_ref, o_ref, *,
                                drop_p, row_tile, n_cols):
    # ---- add (broadcast bias row) + numerically stable softmax over lanes ---
    x = x_ref[...] + bias_ref[...]                      # (TR, D) f32
    m = jnp.max(x, axis=-1, keepdims=True)
    e = jnp.exp(x - m)
    s = jnp.sum(e, axis=-1, keepdims=True)
    # One reciprocal per ROW (not per element) with the dropout survivor scale
    # 1/(1-p) folded in, then a single broadcast multiply.
    inv = (jnp.float32(1.0) / s) * jnp.float32(1.0 / (1.0 - drop_p))
    p = e * inv                                         # softmax * 1/(1-p)

    # ---- dropout mask: stateless counter-based hash (splitmix32 finalizer) --
    # keep iff hash(global_index, seed) >= round(p * 2^31) on the top 31 bits,
    # so P(keep) = 1 - drop_p.  Pure integer VPU ops; no TPU-only PRNG state.
    tr, d = x.shape
    row0 = (pl.program_id(0) * row_tile).astype(jnp.uint32)
    r_idx = jax.lax.broadcasted_iota(jnp.int32, (tr, d), 0).astype(jnp.uint32)
    c_idx = jax.lax.broadcasted_iota(jnp.int32, (tr, d), 1).astype(jnp.uint32)
    k = (r_idx + row0) * jnp.uint32(n_cols) + c_idx
    k = k ^ (seed_ref[0].astype(jnp.uint32) * jnp.uint32(0x9E3779B9))
    k = (k ^ (k >> 16)) * jnp.uint32(0x85EBCA6B)
    k = (k ^ (k >> 13)) * jnp.uint32(0xC2B2AE35)
    k = k ^ (k >> 16)
    k31 = (k >> 1).astype(jnp.int32)                    # uniform in [0, 2^31)
    thresh = jnp.int32(int(round(drop_p * (1 << 31))))
    o_ref[...] = jnp.where(k31 >= thresh, p, jnp.float32(0.0))


def _pick_row_tile(rows, cap):
    """Largest multiple-of-8 divisor of `rows` that is <= cap (or None)."""
    for cand in range(min(cap, rows), 7, -1):
        if cand % 8 == 0 and rows % cand == 0:
            return cand
    return None


def add_softmax_dropout(x, bias, seed, *, drop_p=DROP_P, max_row_tile=1024):
    """x: [B, H, S, D] f32, bias: [1, 1, 1, D] f32, seed: python int."""
    B, H, S, D = x.shape
    rows = B * H * S
    max_row_tile = max(8, (max_row_tile // 8) * 8)

    x2 = x.reshape(rows, D)
    b2 = bias.reshape(1, D).astype(jnp.float32)

    row_tile = _pick_row_tile(rows, max_row_tile)
    padded_rows = rows
    if row_tile is None:
        # Ragged row count: pad to a multiple of the tile, slice afterwards.
        row_tile = max_row_tile
        padded_rows = pl.cdiv(rows, row_tile) * row_tile
        x2 = jnp.pad(x2, ((0, padded_rows - rows), (0, 0)))

    seed_arr = jnp.asarray([seed], dtype=jnp.int32)
    kernel = functools.partial(_add_softmax_dropout_kernel,
                               drop_p=drop_p, row_tile=row_tile, n_cols=D)

    out2 = pl.pallas_call(
        kernel,
        out_shape=jax.ShapeDtypeStruct((padded_rows, D), jnp.float32),
        grid_spec=pltpu.PrefetchScalarGridSpec(
            num_scalar_prefetch=1,
            grid=(padded_rows // row_tile,),
            in_specs=[
                pl.BlockSpec((row_tile, D), lambda i, seed: (i, 0)),
                pl.BlockSpec((1, D), lambda i, seed: (0, 0)),
            ],
            out_specs=pl.BlockSpec((row_tile, D), lambda i, seed: (i, 0)),
        ),
        # Each tile is independent and the mask depends only on (seed, global
        # index), so the grid axis can be sharded across TensorCores (v7x).
        compiler_params=pltpu.CompilerParams(
            dimension_semantics=("parallel",)),
    )(seed_arr, x2, b2)

    return out2[:rows].reshape(B, H, S, D)


if __name__ == "__main__":
    key = jax.random.PRNGKey(0)
    kx, kb = jax.random.split(key)
    # Small shapes consistent with the module's [1, 12, 384, 384] attention
    # scores: [batch=1, heads=4, seq=128, key_len=128].
    B, H, S, D = 1, 4, 128, 128
    x = jax.random.normal(kx, (B, H, S, D), dtype=jnp.float32)
    bias = jax.random.uniform(kb, (1, 1, 1, D), dtype=jnp.float32)

    out = add_softmax_dropout(x, bias, seed=0)
    out = jax.block_until_ready(out)

    # Sanity: kept entries equal softmax(x + bias) / (1 - p); the rest are 0.
    ref = jax.nn.softmax(x + bias, axis=-1)
    kept = out != 0.0
    assert out.shape == x.shape and out.dtype == jnp.float32
    assert bool(jnp.all(jnp.isfinite(out)))
    assert bool(jnp.allclose(jnp.where(kept, out * (1.0 - DROP_P), 0.0),
                             jnp.where(kept, ref, 0.0),
                             rtol=1e-4, atol=1e-6))
    drop_frac = 1.0 - float(jnp.mean(kept.astype(jnp.float32)))
    assert 0.02 < drop_frac < 0.25, drop_frac
    print("KERNEL_OK")
</pallas_src>

<mosaic_0001>
module attributes {stable_mosaic.version = 11 : i64} {
  func.func @_add_softmax_dropout_kernel(%arg0: i32, %arg1: memref<1xi32, #tpu.memory_space<smem>>, %arg2: memref<512x128xf32, #tpu.memory_space<vmem>>, %arg3: memref<1x128xf32, #tpu.memory_space<vmem>>, %arg4: memref<512x128xf32, #tpu.memory_space<vmem>>) attributes {dimension_semantics = [#tpu.dimension_semantics<parallel>], iteration_bounds = array<i64: 1>, scalar_prefetch = 1 : i64, scratch_operands = 0 : i64, tpu.core_type = #tpu.core_type<tc>, window_params = [{transform_indices = @transform_0, window_bounds = array<i64: 512, 128>}, {pipeline_mode = #tpu.pipeline_mode<synchronous>, transform_indices = @transform_1, window_bounds = array<i64: 1, 128>}, {transform_indices = @transform_2, window_bounds = array<i64: 512, 128>}]} {
    %c0 = arith.constant 0 : index
    %c0_0 = arith.constant 0 : index
    %0 = vector.load %arg2[%c0, %c0_0] : memref<512x128xf32, #tpu.memory_space<vmem>>, vector<512x128xf32>
    %c0_1 = arith.constant 0 : index
    %c0_2 = arith.constant 0 : index
    %1 = vector.load %arg3[%c0_1, %c0_2] : memref<1x128xf32, #tpu.memory_space<vmem>>, vector<1x128xf32>
    %2 = vector.broadcast %1 : vector<1x128xf32> to vector<512x128xf32>
    %3 = arith.addf %0, %2 : vector<512x128xf32>
    %cst = arith.constant dense<0xFF800000> : vector<512xf32>
    %4 = vector.multi_reduction <maximumf>, %3, %cst [1] : vector<512x128xf32> to vector<512xf32>
    %5 = vector.shape_cast %4 : vector<512xf32> to vector<512x1xf32>
    %6 = vector.broadcast %5 : vector<512x1xf32> to vector<512x128xf32>
    %7 = arith.subf %3, %6 : vector<512x128xf32>
    %8 = math.exp %7 : vector<512x128xf32>
    %cst_3 = arith.constant dense<0.000000e+00> : vector<512xf32>
    %9 = vector.multi_reduction <add>, %8, %cst_3 [1] : vector<512x128xf32> to vector<512xf32>
    %10 = vector.shape_cast %9 : vector<512xf32> to vector<512x1xf32>
    %cst_4 = arith.constant 1.000000e+00 : f32
    %11 = vector.broadcast %cst_4 : f32 to vector<512x1xf32>
    %12 = arith.divf %11, %10 : vector<512x1xf32>
    %cst_5 = arith.constant 1.11111116 : f32
    %13 = vector.broadcast %cst_5 : f32 to vector<512x1xf32>
    %14 = arith.mulf %12, %13 : vector<512x1xf32>
    %15 = vector.broadcast %14 : vector<512x1xf32> to vector<512x128xf32>
    %16 = arith.mulf %8, %15 : vector<512x128xf32>
    %c512_i32 = arith.constant 512 : i32
    %17 = arith.muli %arg0, %c512_i32 : i32
    %18 = tpu.iota {dimensions = array<i32: 0>} : vector<512x128xi32>
    %19 = tpu.iota {dimensions = array<i32: 1>} : vector<512x128xi32>
    %20 = vector.broadcast %17 : i32 to vector<512x128xi32>
    %21 = arith.addi %18, %20 : vector<512x128xi32>
    %c128_i32 = arith.constant 128 : i32
    %22 = vector.broadcast %c128_i32 : i32 to vector<512x128xi32>
    %23 = arith.muli %21, %22 : vector<512x128xi32>
    %24 = arith.addi %23, %19 : vector<512x128xi32>
    %c0_6 = arith.constant 0 : index
    %25 = memref.load %arg1[%c0_6] : memref<1xi32, #tpu.memory_space<smem>>
    %c-1640531527_i32 = arith.constant -1640531527 : i32
    %26 = arith.muli %25, %c-1640531527_i32 : i32
    %27 = vector.broadcast %26 : i32 to vector<512x128xi32>
    %28 = arith.xori %24, %27 : vector<512x128xi32>
    %c16_i32 = arith.constant 16 : i32
    %29 = vector.broadcast %c16_i32 : i32 to vector<512x128xi32>
    %30 = arith.shrui %28, %29 : vector<512x128xi32>
    %31 = arith.xori %28, %30 : vector<512x128xi32>
    %c-2048144789_i32 = arith.constant -2048144789 : i32
    %32 = vector.broadcast %c-2048144789_i32 : i32 to vector<512x128xi32>
    %33 = arith.muli %31, %32 : vector<512x128xi32>
    %c13_i32 = arith.constant 13 : i32
    %34 = vector.broadcast %c13_i32 : i32 to vector<512x128xi32>
    %35 = arith.shrui %33, %34 : vector<512x128xi32>
    %36 = arith.xori %33, %35 : vector<512x128xi32>
    %c-1028477387_i32 = arith.constant -1028477387 : i32
    %37 = vector.broadcast %c-1028477387_i32 : i32 to vector<512x128xi32>
    %38 = arith.muli %36, %37 : vector<512x128xi32>
    %c16_i32_7 = arith.constant 16 : i32
    %39 = vector.broadcast %c16_i32_7 : i32 to vector<512x128xi32>
    %40 = arith.shrui %38, %39 : vector<512x128xi32>
    %41 = arith.xori %38, %40 : vector<512x128xi32>
    %c1_i32 = arith.constant 1 : i32
    %42 = vector.broadcast %c1_i32 : i32 to vector<512x128xi32>
    %43 = arith.shrui %41, %42 : vector<512x128xi32>
    %c214748365_i32 = arith.constant 214748365 : i32
    %44 = vector.broadcast %c214748365_i32 : i32 to vector<512x128xi32>
    %45 = arith.cmpi sge, %43, %44 : vector<512x128xi32>
    %cst_8 = arith.constant 0.000000e+00 : f32
    %46 = vector.broadcast %cst_8 : f32 to vector<512x128xf32>
    %47 = arith.select %45, %16, %46 : vector<512x128xi1>, vector<512x128xf32>
    %c0_9 = arith.constant 0 : index
    %c0_10 = arith.constant 0 : index
    %48 = vector.load %arg4[%c0_9, %c0_10] : memref<512x128xf32, #tpu.memory_space<vmem>>, vector<512x128xf32>
    tpu.vector_store %arg4[%c0_9, %c0_10], %47 {strides = array<i32>} : memref<512x128xf32, #tpu.memory_space<vmem>>, vector<512x128xf32>,
    return
  }
  func.func @transform_0(%arg0: i32, %arg1: memref<1xi32, #tpu.memory_space<smem>>) -> (i32, i32) {
    %c0_i32 = arith.constant 0 : i32
    %c0_i32_0 = arith.constant 0 : i32
    return %arg0, %c0_i32 : i32, i32
  }
  func.func @transform_1(%arg0: i32, %arg1: memref<1xi32, #tpu.memory_space<smem>>) -> (i32, i32) {
    %c0_i32 = arith.constant 0 : i32
    %c0_i32_0 = arith.constant 0 : i32
    %c0_i32_1 = arith.constant 0 : i32
    return %c0_i32, %c0_i32_0 : i32, i32
  }
  func.func @transform_2(%arg0: i32, %arg1: memref<1xi32, #tpu.memory_space<smem>>) -> (i32, i32) {
    %c0_i32 = arith.constant 0 : i32
    %c0_i32_0 = arith.constant 0 : i32
    return %arg0, %c0_i32 : i32, i32
  }
}

</mosaic_0001>

<bundles_post_ra>
// kernel: tpu_custom_call.1
= control target key start
LH: loop header
LB: loop body
LE: loop exit
PB: predicated region body
PF: predicated region fallthrough
CT: control target
= control target key end

     0   :  { %9 = vsyncpa [#allocation5], 0  ;;  %s3666_s0 = inlined_call_operand.<no memory space> [shape: s32[1], index: 0, kind: input, shape index: {}]   ;;  %s3667_s1 = inlined_call_operand.hbm [shape: f32[512,128], index: 1, kind: input, shape index: {}]   ;;  %s3668_s2 = inlined_call_operand.vmem [shape: f32[1,128], index: 2, kind: input, shape index: {}]   ;;  %s3669_s3 = inlined_call_operand.hbm [shape: f32[512,128], index: 3, kind: output, shape index: {}]  }
   0x1   :  { %10 = vsyncpa [#allocation6], 0  ;;  %s2289_s12 = smov [#allocation4]   ;;  %s2241_s16 = scalar_lea.hbm %s3667_s1, 8192 }
   0x2   :  { %s16_s13 = sshll.u32 %s2289_s12, 4  ;;  %p2242_p0 = scmp.ne.s32.totalorder %s3667_s1, %s2241_s16  ;;  %s17_s13 = int_to_ptr.vmem [resolvable:$true] %s16_s13 }
   0x3   :  { %p2245_p1 = scmp.lt.u32.totalorder %s2241_s16, %s3667_s1 }
   0x5   :  { %p2247_p2 = pnand %p2245_p1, %p2242_p0 }
   0x7   :  { %2250 = shalt.err (!%p2247_p2)
}
   0x8   :  { %s2251_s21 = scalar_lea.vmem %s17_s13, 8192  ;;  %p2256_p4 = scmp.lt.s32.totalorder %s17_s13, %s17_s13 }
   0x9   :  { %p2252_p3 = scmp.ne.s32.totalorder %s17_s13, %s2251_s21  ;;  %p2257_p5 = scmp.lt.s32.totalorder %s2251_s21, %s2251_s21 }
   0xb   :  { %p2258_p6 = por %p2257_p5, %p2256_p4 }
   0xd   :  { %p2259_p7 = pnand %p2258_p6, %p2252_p3 }
   0xf   :  { %2262 = shalt.err (!%p2259_p7)
}
  0x10   :  { %s2290_s22 = smov 128   ;;  %s2291_s23 = smov 8  }
  0x11   :  { %22 = dma.hbm_to_vmem [thread:$0]  %s3667_s1, 8192, %s17_s13, [#allocation5], %s2290_s22, %s2290_s22, %s2291_s23  }
  0x12   :  { %2285 = dma.done.wait [#allocation5], 8192  }
  0x13   :  { %2286 = vsyncadd [#allocation5], 4294959104  ;;  %v28_v0 = vld [vmem:[#allocation4] sm:$0xff]  ;;  %v30_v2 = vld [vmem:[#allocation4 + $0x10] sm:$0xff]  ;;  %s1129_s28 = smul.u32 2654435769, %s3666_s0 }
  0x14   :  { %v2331_v1 = vld [vmem:[%s3668_s2] ss:$0 sm:$0xff]  ;;  %v29_v5 = vld [vmem:[#allocation4 + $0x8] sm:$0xff]  ;;  %v31_v6 = vld [vmem:[#allocation4 + $0x18] sm:$0xff]  ;;  %s2292_s0 = smov [#allocation7]  }
  0x15   :  { %v2334_v3 = vadd.f32 %v2331_v1, %v28_v0  ;;  %v2337_v4 = vadd.f32 %v2331_v1, %v30_v2  ;;  %v2342_v7 = vadd.f32 %v2331_v1, %v29_v5  ;;  %v2345_v8 = vadd.f32 %v2331_v1, %v31_v6  ;;  %v32_v9 = vld [vmem:[#allocation4 + $0x20] sm:$0xff]  ;;  %v33_v10 = vld [vmem:[#allocation4 + $0x28] sm:$0xff]  ;;  %v34_v13 = vld [vmem:[#allocation4 + $0x30] sm:$0xff]  ;;  %s1968_s29 = sshll.u32 %s2292_s0, 4  ;;  %s1969_s29 = int_to_ptr.vmem [resolvable:$true] %s1968_s29 }
  0x16   :  { %v2350_v11 = vadd.f32 %v2331_v1, %v32_v9  ;;  %v2353_v12 = vadd.f32 %v2331_v1, %v33_v10  ;;  %v35_v14 = vld [vmem:[#allocation4 + $0x38] sm:$0xff]  ;;  %v2358_v15 = vadd.f32 %v2331_v1, %v34_v13  ;;  %v36_v17 = vld [vmem:[#allocation4 + $0x40] sm:$0xff]  ;;  %v37_v18 = vld [vmem:[#allocation4 + $0x48] sm:$0xff]  ;;  %s2263_s30 = scalar_lea.vmem %s1969_s29, 8192  ;;  %p2268_p9 = scmp.lt.s32.totalorder %s1969_s29, %s1969_s29 }
  0x17   :  { %163 = vmax.xlane.f32.xlu0 %v2334_v3  ;;  %167 = vmax.xlane.f32.xlu1 %v2337_v4  ;;  %v2361_v16 = vadd.f32 %v2331_v1, %v35_v14  ;;  %v2366_v19 = vadd.f32 %v2331_v1, %v36_v17  ;;  %v2369_v20 = vadd.f32 %v2331_v1, %v37_v18  ;;  %v38_v21 = vld [vmem:[#allocation4 + $0x50] sm:$0xff]  ;;  %v39_v22 = vld [vmem:[#allocation4 + $0x58] sm:$0xff]  ;;  %v40_v25 = vld [vmem:[#allocation4 + $0x60] sm:$0xff]  ;;  %p2264_p8 = scmp.ne.s32.totalorder %s1969_s29, %s2263_s30  ;;  %p2269_p10 = scmp.lt.s32.totalorder %s2263_s30, %s2263_s30 }
  0x18   :  { %v2374_v23 = vadd.f32 %v2331_v1, %v38_v21  ;;  %v2377_v24 = vadd.f32 %v2331_v1, %v39_v22  ;;  %v41_v26 = vld [vmem:[#allocation4 + $0x68] sm:$0xff]  ;;  %v2382_v27 = vadd.f32 %v2331_v1, %v40_v25  ;;  %v42_v29 = vld [vmem:[#allocation4 + $0x70] sm:$0xff]  ;;  %v43_v30 = vld [vmem:[#allocation4 + $0x78] sm:$0xff] }
  0x19   :  { %v2385_v28 = vadd.f32 %v2331_v1, %v41_v26  ;;  %v2390_v31 = vadd.f32 %v2331_v1, %v42_v29  ;;  %v2393_v32 = vadd.f32 %v2331_v1, %v43_v30  ;;  %v44_v33 = vld [vmem:[#allocation4 + $0x80] sm:$0xff]  ;;  %v45_v34 = vld [vmem:[#allocation4 + $0x88] sm:$0xff]  ;;  %v46_v37 = vld [vmem:[#allocation4 + $0x90] sm:$0xff]  ;;  %p2270_p11 = por %p2269_p10, %p2268_p9 }
  0x1a   :  { %v2398_v35 = vadd.f32 %v2331_v1, %v44_v33  ;;  %v2401_v36 = vadd.f32 %v2331_v1, %v45_v34  ;;  %v47_v38 = vld [vmem:[#allocation4 + $0x98] sm:$0xff]  ;;  %v2406_v39 = vadd.f32 %v2331_v1, %v46_v37  ;;  %v48_v41 = vld [vmem:[#allocation4 + $0xa0] sm:$0xff]  ;;  %v49_v42 = vld [vmem:[#allocation4 + $0xa8] sm:$0xff] }
  0x1b   :  { %165 = vmax.xlane.f32.xlu0 %v2342_v7  ;;  %169 = vmax.xlane.f32.xlu1 %v2345_v8  ;;  %v2409_v40 = vadd.f32 %v2331_v1, %v47_v38  ;;  %v2414_v43 = vadd.f32 %v2331_v1, %v48_v41  ;;  %v2417_v44 = vadd.f32 %v2331_v1, %v49_v42  ;;  %v50_v45 = vld [vmem:[#allocation4 + $0xb0] sm:$0xff]  ;;  %v51_v46 = vld [vmem:[#allocation4 + $0xb8] sm:$0xff]  ;;  %v52_v49 = vld [vmem:[#allocation4 + $0xc0] sm:$0xff]  ;;  %p2271_p12 = pnand %p2270_p11, %p2264_p8 }
  0x1c   :  { %v2422_v47 = vadd.f32 %v2331_v1, %v50_v45  ;;  %v2425_v48 = vadd.f32 %v2331_v1, %v51_v46  ;;  %v53_v50 = vld [vmem:[#allocation4 + $0xc8] sm:$0xff]  ;;  %v2430_v51 = vadd.f32 %v2331_v1, %v52_v49  ;;  %v54_v53 = vld [vmem:[#allocation4 + $0xd0] sm:$0xff]  ;;  %v55_v54 = vld [vmem:[#allocation4 + $0xd8] sm:$0xff] }
  0x1d   :  { %v2433_v52 = vadd.f32 %v2331_v1, %v53_v50  ;;  %v2438_v55 = vadd.f32 %v2331_v1, %v54_v53  ;;  %v2441_v56 = vadd.f32 %v2331_v1, %v55_v54  ;;  %v56_v57 = vld [vmem:[#allocation4 + $0xe0] sm:$0xff]  ;;  %v57_v58 = vld [vmem:[#allocation4 + $0xe8] sm:$0xff]  ;;  %v58_v61 = vld [vmem:[#allocation4 + $0xf0] sm:$0xff] }
  0x1e   :  { %v2446_v59 = vadd.f32 %v2331_v1, %v56_v57  ;;  %v2449_v60 = vadd.f32 %v2331_v1, %v57_v58  ;;  %v59_v62 = vld [vmem:[#allocation4 + $0xf8] sm:$0xff]  ;;  %v2454_v63 = vadd.f32 %v2331_v1, %v58_v61  ;;  %v60_v2 = vld [vmem:[#allocation4 + $0x100] sm:$0xff]  ;;  %v61_v5 = vld [vmem:[#allocation4 + $0x108] sm:$0xff] }
  0x1f   :  { %171 = vmax.xlane.f32.xlu0 %v2350_v11  ;;  %173 = vmax.xlane.f32.xlu1 %v2353_v12  ;;  %v2457_v0 = vadd.f32 %v2331_v1, %v59_v62  ;;  %v2462_v6 = vadd.f32 %v2331_v1, %v60_v2  ;;  %v2465_v9 = vadd.f32 %v2331_v1, %v61_v5  ;;  %v62_v10 = vld [vmem:[#allocation4 + $0x110] sm:$0xff]  ;;  %v63_v13 = vld [vmem:[#allocation4 + $0x118] sm:$0xff]  ;;  %v64_v18 = vld [vmem:[#allocation4 + $0x120] sm:$0xff] }
  0x20   :  { %v2470_v14 = vadd.f32 %v2331_v1, %v62_v10  ;;  %v2473_v17 = vadd.f32 %v2331_v1, %v63_v13  ;;  %v65_v21 = vld [vmem:[#allocation4 + $0x128] sm:$0xff]  ;;  %v2478_v22 = vadd.f32 %v2331_v1, %v64_v18  ;;  %v66_v26 = vld [vmem:[#allocation4 + $0x130] sm:$0xff]  ;;  %v67_v29 = vld [vmem:[#allocation4 + $0x138] sm:$0xff] }
  0x21   :  { %v2481_v25 = vadd.f32 %v2331_v1, %v65_v21  ;;  %v2486_v30 = vadd.f32 %v2331_v1, %v66_v26  ;;  %v2489_v33 = vadd.f32 %v2331_v1, %v67_v29  ;;  %v68_v34 = vld [vmem:[#allocation4 + $0x140] sm:$0xff]  ;;  %v69_v37 = vld [vmem:[#allocation4 + $0x148] sm:$0xff]  ;;  %v70_v42 = vld [vmem:[#allocation4 + $0x150] sm:$0xff] }
  0x22   :  { %v2494_v38 = vadd.f32 %v2331_v1, %v68_v34  ;;  %v2497_v41 = vadd.f32 %v2331_v1, %v69_v37  ;;  %v71_v45 = vld [vmem:[#allocation4 + $0x158] sm:$0xff]  ;;  %v2502_v46 = vadd.f32 %v2331_v1, %v70_v42  ;;  %v72_v50 = vld [vmem:[#allocation4 + $0x160] sm:$0xff]  ;;  %v73_v53 = vld [vmem:[#allocation4 + $0x168] sm:$0xff] }
  0x23   :  { %175 = vmax.xlane.f32.xlu0 %v2358_v15  ;;  %177 = vmax.xlane.f32.xlu1 %v2361_v16  ;;  %v2505_v49 = vadd.f32 %v2331_v1, %v71_v45  ;;  %v2510_v54 = vadd.f32 %v2331_v1, %v72_v50  ;;  %v2513_v57 = vadd.f32 %v2331_v1, %v73_v53  ;;  %v74_v58 = vld [vmem:[#allocation4 + $0x170] sm:$0xff]  ;;  %v75_v61 = vld [vmem:[#allocation4 + $0x178] sm:$0xff]  ;;  %v76_v5 = vld [vmem:[#allocation4 + $0x180] sm:$0xff] }
  0x24   :  { %v2518_v62 = vadd.f32 %v2331_v1, %v74_v58  ;;  %v2521_v2 = vadd.f32 %v2331_v1, %v75_v61  ;;  %v77_v10 = vld [vmem:[#allocation4 + $0x188] sm:$0xff]  ;;  %v2526_v13 = vadd.f32 %v2331_v1, %v76_v5  ;;  %v78_v21 = vld [vmem:[#allocation4 + $0x190] sm:$0xff]  ;;  %v79_v26 = vld [vmem:[#allocation4 + $0x198] sm:$0xff] }
  0x25   :  { %v2529_v18 = vadd.f32 %v2331_v1, %v77_v10  ;;  %v2534_v29 = vadd.f32 %v2331_v1, %v78_v21  ;;  %v2537_v34 = vadd.f32 %v2331_v1, %v79_v26  ;;  %v80_v37 = vld [vmem:[#allocation4 + $0x1a0] sm:$0xff]  ;;  %v81_v42 = vld [vmem:[#allocation4 + $0x1a8] sm:$0xff]  ;;  %v82_v53 = vld [vmem:[#allocation4 + $0x1b0] sm:$0xff] }
  0x26   :  { %v2542_v45 = vadd.f32 %v2331_v1, %v80_v37  ;;  %v2545_v50 = vadd.f32 %v2331_v1, %v81_v42  ;;  %v83_v58 = vld [vmem:[#allocation4 + $0x1b8] sm:$0xff]  ;;  %v2550_v61 = vadd.f32 %v2331_v1, %v82_v53  ;;  %v84_v10 = vld [vmem:[#allocation4 + $0x1c0] sm:$0xff]  ;;  %v85_v21 = vld [vmem:[#allocation4 + $0x1c8] sm:$0xff] }
  0x27   :  { %179 = vmax.xlane.f32.xlu0 %v2366_v19  ;;  %181 = vmax.xlane.f32.xlu1 %v2369_v20  ;;  %3739 = vst [vmem:[#allocation10_spill] sm:$0xff] %v2529_v18  ;;  %3740 = vst [vmem:[#allocation11_spill] sm:$0xff] %v2534_v29  ;;  %v2553_v5 = vadd.f32 %v2331_v1, %v83_v58  ;;  %v2558_v26 = vadd.f32 %v2331_v1, %v84_v10  ;;  %v86_v42 = vld [vmem:[#allocation4 + $0x1d0] sm:$0xff] }
  0x28   :  { %3741 = vst [vmem:[#allocation12_spill] sm:$0xff] %v2537_v34  ;;  %3742 = vst [vmem:[#allocation13_spill] sm:$0xff] %v2542_v45  ;;  %v2561_v37 = vadd.f32 %v2331_v1, %v85_v21  ;;  %v2566_v53 = vadd.f32 %v2331_v1, %v86_v42 }
  0x29   :  { %3743 = vst [vmem:[#allocation14_spill] sm:$0xff] %v2545_v50  ;;  %3744 = vst [vmem:[#allocation15_spill] sm:$0xff] %v2550_v61 }
  0x2a   :  { %3745 = vst [vmem:[#allocation16_spill] sm:$0xff] %v2553_v5  ;;  %3746 = vst [vmem:[#allocation17_spill] sm:$0xff] %v2558_v26 }
  0x2b   :  { %183 = vmax.xlane.f32.xlu0 %v2374_v23  ;;  %185 = vmax.xlane.f32.xlu1 %v2377_v24  ;;  %3747 = vst [vmem:[#allocation18_spill] sm:$0xff] %v2561_v37  ;;  %3748 = vst [vmem:[#allocation19_spill] sm:$0xff] %v2566_v53 }
  0x2f   :  { %187 = vmax.xlane.f32.xlu0 %v2382_v27  ;;  %189 = vmax.xlane.f32.xlu1 %v2385_v28 }
  0x33   :  { %191 = vmax.xlane.f32.xlu0 %v2390_v31  ;;  %193 = vmax.xlane.f32.xlu1 %v2393_v32 }
  0x37   :  { %195 = vmax.xlane.f32.xlu0 %v2398_v35  ;;  %197 = vmax.xlane.f32.xlu1 %v2401_v36 }
  0x3b   :  { %199 = vmax.xlane.f32.xlu0 %v2406_v39  ;;  %201 = vmax.xlane.f32.xlu1 %v2409_v40 }
  0x3f   :  { %203 = vmax.xlane.f32.xlu0 %v2414_v43  ;;  %205 = vmax.xlane.f32.xlu1 %v2417_v44 }
  0x43   :  { %207 = vmax.xlane.f32.xlu0 %v2422_v47  ;;  %209 = vmax.xlane.f32.xlu1 %v2425_v48 }
  0x47   :  { %211 = vmax.xlane.f32.xlu0 %v2430_v51  ;;  %213 = vmax.xlane.f32.xlu1 %v2433_v52 }
  0x4b   :  { %215 = vmax.xlane.f32.xlu0 %v2438_v55  ;;  %217 = vmax.xlane.f32.xlu1 %v2441_v56 }
  0x4f   :  { %219 = vmax.xlane.f32.xlu0 %v2446_v59  ;;  %221 = vmax.xlane.f32.xlu1 %v2449_v60 }
  0x53   :  { %223 = vmax.xlane.f32.xlu0 %v2454_v63  ;;  %225 = vmax.xlane.f32.xlu1 %v2457_v0 }
  0x57   :  { %227 = vmax.xlane.f32.xlu0 %v2462_v6  ;;  %229 = vmax.xlane.f32.xlu1 %v2465_v9 }
  0x5b   :  { %231 = vmax.xlane.f32.xlu0 %v2470_v14  ;;  %233 = vmax.xlane.f32.xlu1 %v2473_v17 }
  0x5f   :  { %235 = vmax.xlane.f32.xlu0 %v2478_v22  ;;  %237 = vmax.xlane.f32.xlu1 %v2481_v25 }
  0x63   :  { %239 = vmax.xlane.f32.xlu0 %v2486_v30  ;;  %241 = vmax.xlane.f32.xlu1 %v2489_v33 }
  0x67   :  { %243 = vmax.xlane.f32.xlu0 %v2494_v38  ;;  %245 = vmax.xlane.f32.xlu1 %v2497_v41 }
  0x6b   :  { %247 = vmax.xlane.f32.xlu0 %v2502_v46  ;;  %249 = vmax.xlane.f32.xlu1 %v2505_v49 }
  0x6f   :  { %251 = vmax.xlane.f32.xlu0 %v2510_v54  ;;  %253 = vmax.xlane.f32.xlu1 %v2513_v57 }
  0x73   :  { %255 = vmax.xlane.f32.xlu0 %v2518_v62  ;;  %257 = vmax.xlane.f32.xlu1 %v2521_v2 }
  0x77   :  { %259 = vmax.xlane.f32.xlu0 %v2526_v13  ;;  %261 = vmax.xlane.f32.xlu1 %v2529_v18 }
  0x7b   :  { %263 = vmax.xlane.f32.xlu0 %v2534_v29  ;;  %265 = vmax.xlane.f32.xlu1 %v2537_v34 }
  0x7f   :  { %267 = vmax.xlane.f32.xlu0 %v2542_v45  ;;  %269 = vmax.xlane.f32.xlu1 %v2545_v50  ;;  %v87_v50 = vld [vmem:[#allocation4 + $0x1d8] sm:$0xff] }
  0x80   :  { %v2569_v58 = vadd.f32 %v2331_v1, %v87_v50 }
  0x82   :  { %3749 = vst [vmem:[#allocation20_spill] sm:$0xff] %v2569_v58 }
  0x83   :  { %271 = vmax.xlane.f32.xlu0 %v2550_v61  ;;  %273 = vmax.xlane.f32.xlu1 %v2553_v5  ;;  %v88_v61 = vld [vmem:[#allocation4 + $0x1e0] sm:$0xff]  ;;  %v89_v5 = vld [vmem:[#allocation4 + $0x1e8] sm:$0xff] }
  0x84   :  { %v2574_v10 = vadd.f32 %v2331_v1, %v88_v61  ;;  %v2577_v21 = vadd.f32 %v2331_v1, %v89_v5 }
  0x86   :  { %3750 = vst [vmem:[#allocation21_spill] sm:$0xff] %v2574_v10  ;;  %3751 = vst [vmem:[#allocation22_spill] sm:$0xff] %v2577_v21 }
  0x87   :  { %275 = vmax.xlane.f32.xlu0 %v2558_v26  ;;  %277 = vmax.xlane.f32.xlu1 %v2561_v37  ;;  %v90_v26 = vld [vmem:[#allocation4 + $0x1f0] sm:$0xff]  ;;  %v91_v37 = vld [vmem:[#allocation4 + $0x1f8] sm:$0xff] }
  0x88   :  { %v2582_v50 = vadd.f32 %v2331_v1, %v90_v26  ;;  %v2585_v42 = vadd.f32 %v2331_v1, %v91_v37 }
  0x8a   :  { %3752 = vst [vmem:[#allocation23_spill] sm:$0xff] %v2582_v50  ;;  %3753 = vst [vmem:[#allocation24_spill] sm:$0xff] %v2585_v42 }
  0x8b   :  { %279 = vmax.xlane.f32.xlu0 %v2566_v53  ;;  %281 = vmax.xlane.f32.xlu1 %v2569_v58 }
  0x8f   :  { %283 = vmax.xlane.f32.xlu0 %v2574_v10  ;;  %285 = vmax.xlane.f32.xlu1 %v2577_v21 }
  0x93   :  { %287 = vmax.xlane.f32.xlu0 %v2582_v50  ;;  %289 = vmax.xlane.f32.xlu1 %v2585_v42 }
  0xa4   :  { %v164_v61 = vpop.xlane.xlu0 %163  ;;  %v168_v58 = vpop.xlane.xlu1 %167 }
  0xa5   :  { %v291_v5 = vsub.f32 %v2334_v3, %v164_v61  ;;  %v293_v53 = vsub.f32 %v2337_v4, %v168_v58 }
  0xa7   :  { %v355_v45 = vmul.f32 1.442695, %v291_v5  ;;  %v359_v10 = vmul.f32 1.442695, %v293_v53 }
  0xa8   :  { %v166_v34 = vpop.xlane.xlu0 %165  ;;  %v170_v21 = vpop.xlane.xlu1 %169 }
  0xa9   :  { %1985 = vpow2.f32 %v355_v45  ;;  %v292_v26 = vsub.f32 %v2342_v7, %v166_v34  ;;  %v294_v1 = vsub.f32 %v2345_v8, %v170_v21 }
  0xaa   :  { %1987 = vpow2.f32 %v359_v10 }
  0xab   :  { %v357_v37 = vmul.f32 1.442695, %v292_v26  ;;  %v361_v50 = vmul.f32 1.442695, %v294_v1 }
  0xac   :  { %v172_v29 = vpop.xlane.xlu0 %171  ;;  %v174_v42 = vpop.xlane.xlu1 %173 }
  0xad   :  { %1989 = vpow2.f32 %v357_v37  ;;  %v295_v18 = vsub.f32 %v2350_v11, %v172_v29  ;;  %v296_v3 = vsub.f32 %v2353_v12, %v174_v42  ;;  %v868_v12 = vlaneseq }
  0xae   :  { %1991 = vpow2.f32 %v361_v50 }
  0xaf   :  { %v363_v4 = vmul.f32 1.442695, %v295_v18  ;;  %v365_v53 = vmul.f32 1.442695, %v296_v3 }
  0xb0   :  { %v176_v58 = vpop.xlane.xlu0 %175  ;;  %v178_v61 = vpop.xlane.xlu1 %177 }
  0xb1   :  { %1993 = vpow2.f32 %v363_v4  ;;  %v297_v7 = vsub.f32 %v2358_v15, %v176_v58  ;;  %v298_v8 = vsub.f32 %v2361_v16, %v178_v61  ;;  %v2604_v15 = vshrl.u32 %v868_v12, 7 }
  0xb2   :  { %1995 = vpow2.f32 %v365_v53  ;;  %v2606_v16 = vand.u32 127, %v868_v12 }
  0xb3   :  { %v2597_v34 = vpop.eup %1985  ;;  %v367_v45 = vmul.f32 1.442695, %v297_v7  ;;  %v369_v10 = vmul.f32 1.442695, %v298_v8  ;;  %v870_v58 = vadd.s32 8, %v2604_v15 }
  0xb4   :  { %483 = vadd.xlane.f32.xlu0 %v2597_v34  ;;  %v180_v11 = vpop.xlane.xlu0 %179  ;;  %v182_v29 = vpop.xlane.xlu1 %181 }
  0xb5   :  { %v2600_v21 = vpop.eup %1987  ;;  %1997 = vpow2.f32 %v367_v45  ;;  %v299_v18 = vsub.f32 %v2366_v19, %v180_v11  ;;  %v300_v50 = vsub.f32 %v2369_v20, %v182_v29  ;;  %v1000_v20 = vmul.u32 128, %v2604_v15 }
  0xb6   :  { %1999 = vpow2.f32 %v369_v10  ;;  %v2624_v45 = vstv %s1129_s28 }
  0xb7   :  { %v2608_v42 = vpop.eup %1989  ;;  %v371_v5 = vmul.f32 1.442695, %v299_v18  ;;  %v373_v26 = vmul.f32 1.442695, %v300_v50  ;;  %v1064_v53 = vadd.s32 %v1000_v20, %v2606_v16 }
  0xb8   :  { %487 = vadd.xlane.f32.xlu0 %v2600_v21  ;;  %485 = vadd.xlane.f32.xlu1 %v2608_v42  ;;  %v184_v19 = vpop.xlane.xlu0 %183  ;;  %v186_v1 = vpop.xlane.xlu1 %185 }
  0xb9   :  { %v2616_v37 = vpop.eup %1991  ;;  %2001 = vpow2.f32 %v371_v5  ;;  %v301_v3 = vsub.f32 %v2374_v23, %v184_v19  ;;  %v302_v4 = vsub.f32 %v2377_v24, %v186_v1  ;;  %v1001_v23 = vmul.u32 128, %v870_v58 }
  0xba   :  { %2003 = vpow2.f32 %v373_v26  ;;  %v871_v24 = vadd.s32 16, %v2604_v15  ;;  %v1131_v50 = vxor.u32 %v2624_v45, %v1064_v53 }
  0xbb   :  { %v2622_v61 = vpop.eup %1993  ;;  %v375_v7 = vmul.f32 1.442695, %v301_v3  ;;  %v377_v8 = vmul.f32 1.442695, %v302_v4  ;;  %v1065_v3 = vadd.s32 %v1001_v23, %v2606_v16 }
  0xbc   :  { %489 = vadd.xlane.f32.xlu1 %v2616_v37  ;;  %491 = vadd.xlane.f32.xlu0 %v2622_v61  ;;  %v188_v10 = vpop.xlane.xlu0 %187  ;;  %v190_v11 = vpop.xlane.xlu1 %189  ;;  %v1002_v4 = vmul.u32 128, %v871_v24  ;;  %v1195_v53 = vshrl.u32 %v1131_v50, 16 }
  0xbd   :  { %v2629_v29 = vpop.eup %1995  ;;  %2005 = vpow2.f32 %v375_v7  ;;  %v303_v12 = vsub.f32 %v2382_v27, %v188_v10  ;;  %v304_v18 = vsub.f32 %v2385_v28, %v190_v11  ;;  %v872_v11 = vadd.s32 24, %v2604_v15 }
  0xbe   :  { %2007 = vpow2.f32 %v377_v8 }
  0xbf   :  { %v2634_v5 = vpop.eup %1997  ;;  %v379_v26 = vmul.f32 1.442695, %v303_v12  ;;  %v381_v19 = vmul.f32 1.442695, %v304_v18  ;;  %v1132_v12 = vxor.u32 %v2624_v45, %v1065_v3 }
  0xc0   :  { %493 = vadd.xlane.f32.xlu1 %v2629_v29  ;;  %495 = vadd.xlane.f32.xlu0 %v2634_v5  ;;  %v192_v1 = vpop.xlane.xlu0 %191  ;;  %v194_v20 = vpop.xlane.xlu1 %193 }
  0xc1   :  { %v2639_v58 = vpop.eup %1999  ;;  %2009 = vpow2.f32 %v379_v26  ;;  %v305_v27 = vsub.f32 %v2390_v31, %v192_v1  ;;  %v306_v28 = vsub.f32 %v2393_v32, %v194_v20  ;;  %v1066_v31 = vadd.s32 %v1002_v4, %v2606_v16 }
  0xc2   :  { %3754 = vst [vmem:[#allocation25_spill] sm:$0xff] %v2639_v58  ;;  %2011 = vpow2.f32 %v381_v19  ;;  %v1259_v19 = vxor.u32 %v1195_v53, %v1131_v50  ;;  %v873_v53 = vadd.s32 32, %v2604_v15 }
  0xc3   :  { %v2643_v7 = vpop.eup %2001  ;;  %v383_v8 = vmul.f32 1.442695, %v305_v27  ;;  %v385_v10 = vmul.f32 1.442695, %v306_v28  ;;  %v1003_v28 = vmul.u32 128, %v872_v11 }
  0xc4   :  { %3755 = vst [vmem:[#allocation26_spill] sm:$0xff] %v2643_v7  ;;  %497 = vadd.xlane.f32.xlu1 %v2639_v58  ;;  %499 = vadd.xlane.f32.xlu0 %v2643_v7  ;;  %v196_v23 = vpop.xlane.xlu0 %195  ;;  %v198_v24 = vpop.xlane.xlu1 %197  ;;  %v1196_v7 = vshrl.u32 %v1132_v12, 16  ;;  %v1323_v50 = vmul.u32 2246822507, %v1259_v19 }
  0xc5   :  { %v2650_v18 = vpop.eup %2003  ;;  %2013 = vpow2.f32 %v383_v8  ;;  %v307_v32 = vsub.f32 %v2398_v35, %v196_v23  ;;  %v308_v26 = vsub.f32 %v2401_v36, %v198_v24  ;;  %v1133_v8 = vxor.u32 %v2624_v45, %v1066_v31 }
  0xc6   :  { %2015 = vpow2.f32 %v385_v10  ;;  %v1067_v24 = vadd.s32 %v1003_v28, %v2606_v16 }
  0xc7   :  { %v2654_v1 = vpop.eup %2005  ;;  %v387_v20 = vmul.f32 1.442695, %v307_v32  ;;  %v389_v27 = vmul.f32 1.442695, %v308_v26  ;;  %v1260_v26 = vxor.u32 %v1196_v7, %v1132_v12 }
  0xc8   :  { %501 = vadd.xlane.f32.xlu1 %v2650_v18  ;;  %503 = vadd.xlane.f32.xlu0 %v2654_v1  ;;  %v200_v3 = vpop.xlane.xlu0 %199  ;;  %v202_v4 = vpop.xlane.xlu1 %201 }
  0xc9   :  { %v2659_v58 = vpop.eup %2007  ;;  %2017 = vpow2.f32 %v387_v20  ;;  %v309_v35 = vsub.f32 %v2406_v39, %v200_v3  ;;  %v310_v36 = vsub.f32 %v2409_v40, %v202_v4  ;;  %v1197_v39 = vshrl.u32 %v1133_v8, 16 }
  0xca   :  { %2019 = vpow2.f32 %v389_v27  ;;  %v1387_v27 = vshrl.u32 %v1323_v50, 13  ;;  %v1004_v3 = vmul.u32 128, %v873_v53 }
  0xcb   :  { %v2664_v10 = vpop.eup %2009  ;;  %v391_v11 = vmul.f32 1.442695, %v309_v35  ;;  %v393_v23 = vmul.f32 1.442695, %v310_v36  ;;  %v1134_v36 = vxor.u32 %v2624_v45, %v1067_v24 }
  0xcc   :  { %3756 = vst [vmem:[#allocation27_spill] sm:$0xff] %v2664_v10  ;;  %505 = vadd.xlane.f32.xlu1 %v2659_v58  ;;  %507 = vadd.xlane.f32.xlu0 %v2664_v10  ;;  %v204_v31 = vpop.xlane.xlu0 %203  ;;  %v206_v32 = vpop.xlane.xlu1 %205  ;;  %v1261_v10 = vxor.u32 %v1197_v39, %v1133_v8 }
  0xcd   :  { %v2669_v20 = vpop.eup %2011  ;;  %2021 = vpow2.f32 %v391_v11  ;;  %v311_v40 = vsub.f32 %v2414_v43, %v204_v31  ;;  %v312_v19 = vsub.f32 %v2417_v44, %v206_v32  ;;  %v1324_v11 = vmul.u32 2246822507, %v1260_v26 }
  0xce   :  { %2023 = vpow2.f32 %v393_v23  ;;  %v1451_v23 = vxor.u32 %v1387_v27, %v1323_v50  ;;  %v1068_v31 = vadd.s32 %v1004_v3, %v2606_v16 }
  0xcf   :  { %v2673_v4 = vpop.eup %2013  ;;  %v395_v28 = vmul.f32 1.442695, %v311_v40  ;;  %v397_v35 = vmul.f32 1.442695, %v312_v19  ;;  %v1198_v19 = vshrl.u32 %v1134_v36, 16  ;;  %v1388_v39 = vshrl.u32 %v1324_v11, 13 }
  0xd0   :  { %509 = vadd.xlane.f32.xlu1 %v2669_v20  ;;  %511 = vadd.xlane.f32.xlu0 %v2673_v4  ;;  %v208_v7 = vpop.xlane.xlu0 %207  ;;  %v210_v12 = vpop.xlane.xlu1 %209  ;;  %v1515_v3 = vmul.u32 3266489909, %v1451_v23  ;;  %v875_v23 = vadd.s32 48, %v2604_v15 }
  0xd1   :  { %v2678_v43 = vpop.eup %2015  ;;  %2025 = vpow2.f32 %v395_v28  ;;  %v313_v44 = vsub.f32 %v2422_v47, %v208_v7  ;;  %v314_v53 = vsub.f32 %v2425_v48, %v210_v12  ;;  %v1325_v28 = vmul.u32 2246822507, %v1261_v10 }
  0xd2   :  { %3757 = vst [vmem:[#allocation28_spill] sm:$0xff] %v2678_v43  ;;  %2027 = vpow2.f32 %v397_v35  ;;  %v874_v47 = vadd.s32 40, %v2604_v15  ;;  %v1135_v35 = vxor.u32 %v2624_v45, %v1068_v31 }
  0xd3   :  { %v2683_v32 = vpop.eup %2017  ;;  %v399_v24 = vmul.f32 1.442695, %v313_v44  ;;  %v401_v40 = vmul.f32 1.442695, %v314_v53  ;;  %v2695_v53 = vxor.u32 %v1198_v19, %v1134_v36  ;;  %v1579_v19 = vshrl.u32 %v1515_v3, 16 }
  0xd4   :  { %3758 = vst [vmem:[#allocation29_spill] sm:$0xff] %v2683_v32  ;;  %513 = vadd.xlane.f32.xlu1 %v2678_v43  ;;  %515 = vadd.xlane.f32.xlu0 %v2683_v32  ;;  %v212_v8 = vpop.xlane.xlu0 %211  ;;  %v214_v26 = vpop.xlane.xlu1 %213  ;;  %v2699_v32 = vxor.u32 %v1388_v39, %v1324_v11  ;;  %v897_v43 = vadd.s32 224, %v2604_v15 }
  0xd5   :  { %v2688_v48 = vpop.eup %2019  ;;  %2029 = vpow2.f32 %v399_v24  ;;  %v315_v50 = vsub.f32 %v2430_v51, %v212_v8  ;;  %v316_v27 = vsub.f32 %v2433_v52, %v214_v26  ;;  %v1389_v51 = vshrl.u32 %v1325_v28, 13 }
  0xd6   :  { %3759 = vst [vmem:[#allocation30_spill] sm:$0xff] %v2688_v48  ;;  %2031 = vpow2.f32 %v401_v40  ;;  %v1005_v52 = vmul.u32 128, %v874_v47  ;;  %v1199_v8 = vshrl.u32 %v1135_v35, 16  ;;  %v1326_v11 = vmul.u32 2246822507, %v2695_v53 }
  0xd7   :  { %v2693_v7 = vpop.eup %2021  ;;  %v403_v12 = vmul.f32 1.442695, %v315_v50  ;;  %v405_v44 = vmul.f32 1.442695, %v316_v27 }
  0xd8   :  { %3760 = vst [vmem:[#allocation31_spill] sm:$0xff] %v2693_v7  ;;  %517 = vadd.xlane.f32.xlu1 %v2688_v48  ;;  %519 = vadd.xlane.f32.xlu0 %v2693_v7  ;;  %v216_v10 = vpop.xlane.xlu0 %215  ;;  %v218_v24 = vpop.xlane.xlu1 %217 }
  0xd9   :  { %v2702_v31 = vpop.eup %2023  ;;  %2033 = vpow2.f32 %v403_v12  ;;  %v317_v40 = vsub.f32 %v2438_v55, %v216_v10  ;;  %v318_v36 = vsub.f32 %v2441_v56, %v218_v24  ;;  %v1516_v12 = vmul.u32 3266489909, %v2699_v32 }
  0xda   :  { %3761 = vst [vmem:[#allocation32_spill] sm:$0xff] %v2702_v31  ;;  %2035 = vpow2.f32 %v405_v44  ;;  %v2712_v55 = vxor.u32 %v1389_v51, %v1325_v28  ;;  %v1069_v56 = vadd.s32 %v1005_v52, %v2606_v16  ;;  %v1006_v10 = vmul.u32 128, %v875_v23 }
  0xdb   :  { %v2706_v26 = vpop.eup %2025  ;;  %v407_v50 = vmul.f32 1.442695, %v317_v40  ;;  %v409_v27 = vmul.f32 1.442695, %v318_v36  ;;  %v876_v40 = vadd.s32 56, %v2604_v15  ;;  %v2720_v36 = vxor.u32 %v1579_v19, %v1515_v3 }
  0xdc   :  { %3762 = vst [vmem:[#allocation33_spill] sm:$0xff] %v2706_v26  ;;  %521 = vadd.xlane.f32.xlu1 %v2702_v31  ;;  %523 = vadd.xlane.f32.xlu0 %v2706_v26  ;;  %v220_v39 = vpop.xlane.xlu0 %219  ;;  %v222_v47 = vpop.xlane.xlu1 %221  ;;  %v2722_v26 = vxor.u32 %v1199_v8, %v1135_v35  ;;  %v877_v32 = vadd.s32 64, %v2604_v15  ;;  %v1390_v23 = vshrl.u32 %v1326_v11, 13  ;;  %v1517_v3 = vmul.u32 3266489909, %v2712_v55 }
  0xdd   :  { %v2715_v24 = vpop.eup %2027  ;;  %2037 = vpow2.f32 %v407_v50  ;;  %v319_v44 = vsub.f32 %v2446_v59, %v220_v39  ;;  %v320_v53 = vsub.f32 %v2449_v60, %v222_v47  ;;  %v1580_v50 = vshrl.u32 %v1516_v12, 16 }
  0xde   :  { %3763 = vst [vmem:[#allocation34_spill] sm:$0xff] %v2715_v24  ;;  %2039 = vpow2.f32 %v409_v27  ;;  %v1136_v35 = vxor.u32 %v2624_v45, %v1069_v56  ;;  %v1070_v19 = vadd.s32 %v1006_v10, %v2606_v16  ;;  %v1007_v47 = vmul.u32 128, %v876_v40 }
  0xdf   :  { %v2725_v28 = vpop.eup %2029  ;;  %v411_v51 = vmul.f32 1.442695, %v319_v44  ;;  %v413_v52 = vmul.f32 1.442695, %v320_v53  ;;  %v1327_v53 = vmul.u32 2246822507, %v2722_v26  ;;  %v2741_v31 = vxor.u32 %v1390_v23, %v1326_v11 }
  0xe0   :  { %3764 = vst [vmem:[#allocation35_spill] sm:$0xff] %v2725_v28  ;;  %525 = vadd.xlane.f32.xlu1 %v2715_v24  ;;  %527 = vadd.xlane.f32.xlu0 %v2725_v28  ;;  %v224_v59 = vpop.xlane.xlu0 %223  ;;  %v226_v60 = vpop.xlane.xlu1 %225  ;;  %v1008_v28 = vmul.u32 128, %v877_v32  ;;  %v878_v24 = vadd.s32 72, %v2604_v15  ;;  %v2745_v40 = vxor.u32 %v1580_v50, %v1516_v12  ;;  %v1200_v26 = vshrl.u32 %v1136_v35, 16 }
  0xe1   :  { %v2732_v8 = vpop.eup %2031  ;;  %2041 = vpow2.f32 %v411_v51  ;;  %v321_v27 = vsub.f32 %v2454_v63, %v224_v59  ;;  %v322_v39 = vsub.f32 %v2457_v0, %v226_v60  ;;  %v1581_v51 = vshrl.u32 %v1517_v3, 16 }
  0xe2   :  { %3765 = vst [vmem:[#allocation36_spill] sm:$0xff] %v2732_v8  ;;  %2043 = vpow2.f32 %v413_v52  ;;  %v1137_v32 = vxor.u32 %v2624_v45, %v1070_v19  ;;  %v1071_v23 = vadd.s32 %v1007_v47, %v2606_v16  ;;  %v1391_v60 = vshrl.u32 %v1327_v53, 13 }
  0xe3   :  { %v2739_v55 = vpop.eup %2033  ;;  %v415_v56 = vmul.f32 1.442695, %v321_v27  ;;  %v417_v10 = vmul.f32 1.442695, %v322_v39  ;;  %v1072_v27 = vadd.s32 %v1008_v28, %v2606_v16  ;;  %v1009_v39 = vmul.u32 128, %v878_v24 }
  0xe4   :  { %3766 = vst [vmem:[#allocation37_spill] sm:$0xff] %v2739_v55  ;;  %529 = vadd.xlane.f32.xlu1 %v2732_v8  ;;  %531 = vadd.xlane.f32.xlu0 %v2739_v55  ;;  %v228_v63 = vpop.xlane.xlu0 %227  ;;  %v230_v0 = vpop.xlane.xlu1 %229  ;;  %v879_v12 = vadd.s32 80, %v2604_v15  ;;  %v1518_v55 = vmul.u32 3266489909, %v2741_v31  ;;  %v2760_v47 = vxor.u32 %v1581_v51, %v1517_v3  ;;  %v1201_v24 = vshrl.u32 %v1137_v32, 16 }
  0xe5   :  { %v2748_v59 = vpop.eup %2035  ;;  %2045 = vpow2.f32 %v415_v56  ;;  %v323_v52 = vsub.f32 %v2462_v6, %v228_v63  ;;  %v324_v11 = vsub.f32 %v2465_v9, %v230_v0  ;;  %v2762_v56 = vxor.u32 %v1200_v26, %v1136_v35 }
  0xe6   :  { %3767 = vst [vmem:[#allocation38_spill] sm:$0xff] %v2748_v59  ;;  %2047 = vpow2.f32 %v417_v10  ;;  %v880_v28 = vadd.s32 88, %v2604_v15  ;;  %v1138_v0 = vxor.u32 %v2624_v45, %v1071_v23  ;;  %v1073_v3 = vadd.s32 %v1009_v39, %v2606_v16 }
  0xe7   :  { %v2755_v50 = vpop.eup %2037  ;;  %v419_v44 = vmul.f32 1.442695, %v323_v52  ;;  %v421_v19 = vmul.f32 1.442695, %v324_v11  ;;  %v2770_v52 = vxor.u32 %v1391_v60, %v1327_v53  ;;  %v1139_v11 = vxor.u32 %v2624_v45, %v1072_v27 }
  0xe8   :  { %3768 = vst [vmem:[#allocation39_spill] sm:$0xff] %v2755_v50  ;;  %533 = vadd.xlane.f32.xlu1 %v2748_v59  ;;  %535 = vadd.xlane.f32.xlu0 %v2755_v50  ;;  %v232_v6 = vpop.xlane.xlu0 %231  ;;  %v234_v9 = vpop.xlane.xlu1 %233  ;;  %v1010_v35 = vmul.u32 128, %v879_v12  ;;  %v1582_v59 = vshrl.u32 %v1518_v55, 16  ;;  %v1328_v53 = vmul.u32 2246822507, %v2762_v56  ;;  %v2780_v23 = vxor.u32 %v1201_v24, %v1137_v32 }
  0xe9   :  { %v2765_v63 = vpop.eup %2039  ;;  %2049 = vpow2.f32 %v419_v44  ;;  %v325_v10 = vsub.f32 %v2470_v14, %v232_v6  ;;  %v326_v31 = vsub.f32 %v2473_v17, %v234_v9  ;;  %v1011_v60 = vmul.u32 128, %v880_v28 }
  0xea   :  { %3769 = vst [vmem:[#allocation40_spill] sm:$0xff] %v2765_v63  ;;  %2051 = vpow2.f32 %v421_v19  ;;  %v1202_v19 = vshrl.u32 %v1138_v0, 16  ;;  %v1519_v6 = vmul.u32 3266489909, %v2770_v52  ;;  %v1203_v9 = vshrl.u32 %v1139_v11, 16 }
  0xeb   :  { %v2774_v51 = vpop.eup %2041  ;;  %v423_v26 = vmul.f32 1.442695, %v325_v10  ;;  %v425_v50 = vmul.f32 1.442695, %v326_v31  ;;  %v1140_v10 = vxor.u32 %v2624_v45, %v1073_v3  ;;  %v1074_v31 = vadd.s32 %v1010_v35, %v2606_v16 }
  0xec   :  { %3770 = vst [vmem:[#allocation41_spill] sm:$0xff] %v2774_v51  ;;  %537 = vadd.xlane.f32.xlu1 %v2765_v63  ;;  %539 = vadd.xlane.f32.xlu0 %v2774_v51  ;;  %v236_v14 = vpop.xlane.xlu0 %235  ;;  %v238_v17 = vpop.xlane.xlu1 %237  ;;  %v2791_v24 = vxor.u32 %v1582_v59, %v1518_v55  ;;  %v1392_v52 = vshrl.u32 %v1328_v53, 13  ;;  %v1329_v3 = vmul.u32 2246822507, %v2780_v23  ;;  %v1075_v35 = vadd.s32 %v1011_v60, %v2606_v16 }
  0xed   :  { %v2782_v27 = vpop.eup %2043  ;;  %2053 = vpow2.f32 %v423_v26  ;;  %v327_v39 = vsub.f32 %v2478_v22, %v236_v14  ;;  %v328_v12 = vsub.f32 %v2481_v25, %v238_v17  ;;  %v2802_v59 = vxor.u32 %v1202_v19, %v1138_v0 }
  0xee   :  { %3771 = vst [vmem:[#allocation42_spill] sm:$0xff] %v2782_v27  ;;  %2055 = vpow2.f32 %v425_v50  ;;  %v1583_v14 = vshrl.u32 %v1519_v6, 16  ;;  %v2804_v17 = vxor.u32 %v1203_v9, %v1139_v11  ;;  %v2812_v0 = vxor.u32 %v1392_v52, %v1328_v53 }
  0xef   :  { %v2789_v44 = vpop.eup %2045  ;;  %v427_v32 = vmul.f32 1.442695, %v327_v39  ;;  %v429_v56 = vmul.f32 1.442695, %v328_v12  ;;  %v1204_v39 = vshrl.u32 %v1140_v10, 16  ;;  %v1141_v12 = vxor.u32 %v2624_v45, %v1074_v31 }
  0xf0   :  { %3772 = vst [vmem:[#allocation43_spill] sm:$0xff] %v2789_v44  ;;  %541 = vadd.xlane.f32.xlu1 %v2782_v27  ;;  %543 = vadd.xlane.f32.xlu0 %v2789_v44  ;;  %v240_v22 = vpop.xlane.xlu0 %239  ;;  %v242_v25 = vpop.xlane.xlu1 %241  ;;  %v1393_v11 = vshrl.u32 %v1329_v3, 13  ;;  %v1142_v19 = vxor.u32 %v2624_v45, %v1075_v35  ;;  %v881_v9 = vadd.s32 96, %v2604_v15 }
  0xf1   :  { %v2798_v26 = vpop.eup %2047  ;;  %2057 = vpow2.f32 %v427_v32  ;;  %v329_v50 = vsub.f32 %v2486_v30, %v240_v22  ;;  %v330_v55 = vsub.f32 %v2489_v33, %v242_v25  ;;  %v1330_v22 = vmul.u32 2246822507, %v2802_v59 }
  0xf2   :  { %3773 = vst [vmem:[#allocation44_spill] sm:$0xff] %v2798_v26  ;;  %2059 = vpow2.f32 %v429_v56  ;;  %v2821_v25 = vxor.u32 %v1583_v14, %v1519_v6  ;;  %v2824_v53 = vxor.u32 %v1204_v39, %v1140_v10  ;;  %v1205_v52 = vshrl.u32 %v1141_v12, 16 }
  0xf3   :  { %v2807_v28 = vpop.eup %2049  ;;  %v431_v23 = vmul.f32 1.442695, %v329_v50  ;;  %v433_v60 = vmul.f32 1.442695, %v330_v55  ;;  %v1331_v50 = vmul.u32 2246822507, %v2804_v17  ;;  %v2831_v59 = vxor.u32 %v1393_v11, %v1329_v3 }
  0xf4   :  { %3774 = vst [vmem:[#allocation45_spill] sm:$0xff] %v2807_v28  ;;  %545 = vadd.xlane.f32.xlu1 %v2798_v26  ;;  %547 = vadd.xlane.f32.xlu0 %v2807_v28  ;;  %v244_v30 = vpop.xlane.xlu0 %243  ;;  %v246_v33 = vpop.xlane.xlu1 %245  ;;  %v1012_v28 = vmul.u32 128, %v881_v9  ;;  %v1520_v6 = vmul.u32 3266489909, %v2812_v0  ;;  %v1206_v14 = vshrl.u32 %v1142_v19, 16  ;;  %v882_v10 = vadd.s32 104, %v2604_v15 }
  0xf5   :  { %v2816_v31 = vpop.eup %2051  ;;  %2061 = vpow2.f32 %v431_v23  ;;  %v331_v32 = vsub.f32 %v2494_v38, %v244_v30  ;;  %v332_v56 = vsub.f32 %v2497_v41, %v246_v33  ;;  %v1395_v30 = vshrl.u32 %v1331_v50, 13 }
  0xf6   :  { %3775 = vst [vmem:[#allocation46_spill] sm:$0xff] %v2816_v31  ;;  %2063 = vpow2.f32 %v433_v60  ;;  %v1394_v60 = vshrl.u32 %v1330_v22, 13  ;;  %v1332_v33 = vmul.u32 2246822507, %v2824_v53  ;;  %v2839_v9 = vxor.u32 %v1205_v52, %v1141_v12 }
  0xf7   :  { %v2826_v55 = vpop.eup %2053  ;;  %v435_v35 = vmul.f32 1.442695, %v331_v32  ;;  %v437_v44 = vmul.f32 1.442695, %v332_v56  ;;  %v1076_v0 = vadd.s32 %v1012_v28, %v2606_v16  ;;  %v1013_v56 = vmul.u32 128, %v882_v10 }
  0xf8   :  { %3776 = vst [vmem:[#allocation47_spill] sm:$0xff] %v2826_v55  ;;  %549 = vadd.xlane.f32.xlu1 %v2816_v31  ;;  %551 = vadd.xlane.f32.xlu0 %v2826_v55  ;;  %v248_v38 = vpop.xlane.xlu0 %247  ;;  %v250_v41 = vpop.xlane.xlu1 %249  ;;  %v2847_v53 = vxor.u32 %v1206_v14, %v1142_v19  ;;  %v883_v12 = vadd.s32 112, %v2604_v15  ;;  %v2855_v10 = vxor.u32 %v1394_v60, %v1330_v22 }
  0xf9   :  { %v2834_v17 = vpop.eup %2055  ;;  %2065 = vpow2.f32 %v435_v35  ;;  %v333_v39 = vsub.f32 %v2502_v46, %v248_v38  ;;  %v334_v23 = vsub.f32 %v2505_v49, %v250_v41  ;;  %v1584_v35 = vshrl.u32 %v1520_v6, 16 }
  0xfa   :  { %3777 = vst [vmem:[#allocation48_spill] sm:$0xff] %v2834_v17  ;;  %2067 = vpow2.f32 %v437_v44  ;;  %v1521_v38 = vmul.u32 3266489909, %v2831_v59  ;;  %v1143_v41 = vxor.u32 %v2624_v45, %v1076_v0  ;;  %v1077_v59 = vadd.s32 %v1013_v56, %v2606_v16 }
  0xfb   :  { %v2842_v3 = vpop.eup %2057  ;;  %v439_v11 = vmul.f32 1.442695, %v333_v39  ;;  %v441_v32 = vmul.f32 1.442695, %v334_v23  ;;  %v2857_v39 = vxor.u32 %v1395_v30, %v1331_v50  ;;  %v1396_v23 = vshrl.u32 %v1332_v33, 13 }
  0xfc   :  { %3778 = vst [vmem:[#allocation49_spill] sm:$0xff] %v2842_v3  ;;  %553 = vadd.xlane.f32.xlu1 %v2834_v17  ;;  %555 = vadd.xlane.f32.xlu0 %v2842_v3  ;;  %v252_v46 = vpop.xlane.xlu0 %251  ;;  %v254_v49 = vpop.xlane.xlu1 %253  ;;  %v1585_v50 = vshrl.u32 %v1521_v38, 16  ;;  %v1334_v60 = vmul.u32 2246822507, %v2847_v53  ;;  %v1014_v30 = vmul.u32 128, %v883_v12 }
  0xfd   :  { %v2850_v28 = vpop.eup %2059  ;;  %2069 = vpow2.f32 %v439_v11  ;;  %v335_v44 = vsub.f32 %v2510_v54, %v252_v46  ;;  %v336_v52 = vsub.f32 %v2513_v57, %v254_v49  ;;  %v1333_v11 = vmul.u32 2246822507, %v2839_v9 }
  0xfe   :  { %3779 = vst [vmem:[#allocation50_spill] sm:$0xff] %v2850_v28  ;;  %2071 = vpow2.f32 %v441_v32  ;;  %v1207_v9 = vshrl.u32 %v1143_v41, 16  ;;  %v2871_v46 = vxor.u32 %v1584_v35, %v1520_v6  ;;  %v1522_v49 = vmul.u32 3266489909, %v2855_v10 }
  0xff   :  { %v2860_v19 = vpop.eup %2061  ;;  %v443_v14 = vmul.f32 1.442695, %v335_v44  ;;  %v445_v3 = vmul.f32 1.442695, %v336_v52  ;;  %v1523_v44 = vmul.u32 3266489909, %v2857_v39  ;;  %v1144_v52 = vxor.u32 %v2624_v45, %v1077_v59 }
 0x100   :  { %3780 = vst [vmem:[#allocation51_spill] sm:$0xff] %v2860_v19  ;;  %557 = vadd.xlane.f32.xlu1 %v2850_v28  ;;  %559 = vadd.xlane.f32.xlu0 %v2860_v19  ;;  %v256_v54 = vpop.xlane.xlu0 %255  ;;  %v258_v57 = vpop.xlane.xlu1 %257  ;;  %v2878_v19 = vxor.u32 %v1396_v23, %v1332_v33  ;;  %v2882_v6 = vxor.u32 %v1585_v50, %v1521_v38  ;;  %v1397_v35 = vshrl.u32 %v1333_v11, 13  ;;  %v1398_v10 = vshrl.u32 %v1334_v60, 13 }
 0x101   :  { %v2867_v0 = vpop.eup %2063  ;;  %2073 = vpow2.f32 %v443_v14  ;;  %v337_v32 = vsub.f32 %v2518_v62, %v256_v54  ;;  %v338_v56 = vsub.f32 %v2521_v2, %v258_v57  ;;  %v1078_v39 = vadd.s32 %v1014_v30, %v2606_v16  ;;  %v3784_v14 = vld [vmem:[#allocation10_spill] sm:$0xff] }
 0x102   :  { %3781 = vst [vmem:[#allocation52_spill] sm:$0xff] %v2867_v0  ;;  %2075 = vpow2.f32 %v445_v3  ;;  %v2889_v23 = vxor.u32 %v1207_v9, %v1143_v41  ;;  %v1586_v57 = vshrl.u32 %v1522_v49, 16  ;;  %v1524_v30 = vmul.u32 3266489909, %v2878_v19  ;;  %v3788_v19 = vld [vmem:[#allocation12_spill] sm:$0xff] }
 0x103   :  { %v2876_v22 = vpop.eup %2065  ;;  %v447_v53 = vmul.f32 1.442695, %v337_v32  ;;  %v449_v12 = vmul.f32 1.442695, %v338_v56  ;;  %v1587_v32 = vshrl.u32 %v1523_v44, 16  ;;  %v1208_v56 = vshrl.u32 %v1144_v52, 16 }
 0x104   :  { %3782 = vst [vmem:[#allocation53_spill] sm:$0xff] %v2876_v22  ;;  %561 = vadd.xlane.f32.xlu1 %v2867_v0  ;;  %563 = vadd.xlane.f32.xlu0 %v2876_v22  ;;  %v260_v62 = vpop.xlane.xlu0 %259  ;;  %v262_v2 = vpop.xlane.xlu1 %261  ;;  %v2898_v9 = vxor.u32 %v1397_v35, %v1333_v11  ;;  %v1335_v54 = vmul.u32 2246822507, %v2889_v23  ;;  %v884_v11 = vadd.s32 120, %v2604_v15 }
 0x105   :  { %v2885_v59 = vpop.eup %2067  ;;  %2077 = vpow2.f32 %v447_v53  ;;  %v339_v3 = vsub.f32 %v2526_v13, %v260_v62  ;;  %v340_v33 = vsub.f32 %v3784_v14, %v262_v2  ;;  %v2900_v62 = vxor.u32 %v1398_v10, %v1334_v60 }
 0x106   :  { %3783 = vst [vmem:[#allocation54_spill] sm:$0xff] %v2885_v59  ;;  %2079 = vpow2.f32 %v449_v12  ;;  %v1145_v2 = vxor.u32 %v2624_v45, %v1078_v39  ;;  %v3787_v12 = vld [vmem:[#allocation11_spill] sm:$0xff]  ;;  %v2912_v41 = vxor.u32 %v1208_v56, %v1144_v52  ;;  %v1588_v39 = vshrl.u32 %v1524_v30, 16 }
 0x107   :  { %v2892_v38 = vpop.eup %2069  ;;  %v451_v50 = vmul.f32 1.442695, %v339_v3  ;;  %v453_v22 = vmul.f32 1.442695, %v340_v33 }
 0x108   :  { %3785 = vst [vmem:[#allocation10_spill] sm:$0xff] %v2892_v38  ;;  %565 = vadd.xlane.f32.xlu1 %v2885_v59  ;;  %567 = vadd.xlane.f32.xlu0 %v2892_v38  ;;  %v264_v13 = vpop.xlane.xlu0 %263  ;;  %v266_v53 = vpop.xlane.xlu1 %265  ;;  %v2908_v38 = vxor.u32 %v1586_v57, %v1522_v49  ;;  %v2910_v59 = vxor.u32 %v1587_v32, %v1523_v44  ;;  %v1525_v49 = vmul.u32 3266489909, %v2898_v9  ;;  %v1526_v44 = vmul.u32 3266489909, %v2900_v62 }
 0x109   :  { %v2903_v14 = vpop.eup %2071  ;;  %2081 = vpow2.f32 %v451_v50  ;;  %v341_v3 = vsub.f32 %v3787_v12, %v264_v13  ;;  %v342_v33 = vsub.f32 %v3788_v19, %v266_v53  ;;  %v1209_v52 = vshrl.u32 %v1145_v2, 16  ;;  %v3792_v13 = vld [vmem:[#allocation14_spill] sm:$0xff] }
 0x10a   :  { %3786 = vst [vmem:[#allocation55_spill] sm:$0xff] %v2903_v14  ;;  %2083 = vpow2.f32 %v453_v22  ;;  %v885_v57 = vadd.s32 128, %v2604_v15  ;;  %v3791_v22 = vld [vmem:[#allocation13_spill] sm:$0xff]  ;;  %v1399_v12 = vshrl.u32 %v1335_v54, 13  ;;  %v1336_v19 = vmul.u32 2246822507, %v2912_v41 }
 0x10b   :  { %v2915_v60 = vpop.eup %2073  ;;  %v455_v35 = vmul.f32 1.442695, %v341_v3  ;;  %v457_v10 = vmul.f32 1.442695, %v342_v33  ;;  %v1015_v33 = vmul.u32 128, %v884_v11  ;;  %v886_v9 = vadd.s32 136, %v2604_v15 }
 0x10c   :  { %3789 = vst [vmem:[#allocation11_spill] sm:$0xff] %v2915_v60  ;;  %569 = vadd.xlane.f32.xlu1 %v2903_v14  ;;  %571 = vadd.xlane.f32.xlu0 %v2915_v60  ;;  %v268_v50 = vpop.xlane.xlu0 %267  ;;  %v270_v23 = vpop.xlane.xlu1 %269  ;;  %v2931_v0 = vxor.u32 %v1588_v39, %v1524_v30  ;;  %v2936_v41 = vxor.u32 %v1209_v52, %v1145_v2  ;;  %v1016_v11 = vmul.u32 128, %v885_v57  ;;  %v1590_v3 = vshrl.u32 %v1526_v44, 16 }
 0x10d   :  { %v2922_v32 = vpop.eup %2075  ;;  %2085 = vpow2.f32 %v455_v35  ;;  %v343_v56 = vsub.f32 %v3791_v22, %v268_v50  ;;  %v344_v53 = vsub.f32 %v3792_v13, %v270_v23  ;;  %v1589_v22 = vshrl.u32 %v1525_v49, 16 }
 0x10e   :  { %3790 = vst [vmem:[#allocation12_spill] sm:$0xff] %v2922_v32  ;;  %2087 = vpow2.f32 %v457_v10  ;;  %v3795_v10 = vld [vmem:[#allocation15_spill] sm:$0xff]  ;;  %v2942_v39 = vxor.u32 %v1399_v12, %v1335_v54  ;;  %v1017_v28 = vmul.u32 128, %v886_v9  ;;  %v1337_v12 = vmul.u32 2246822507, %v2936_v41 }
 0x10f   :  { %v2929_v60 = vpop.eup %2077  ;;  %v459_v62 = vmul.f32 1.442695, %v343_v56  ;;  %v461_v14 = vmul.f32 1.442695, %v344_v53  ;;  %v3796_v53 = vld [vmem:[#allocation16_spill] sm:$0xff]  ;;  %v2950_v54 = vxor.u32 %v1589_v22, %v1525_v49  ;;  %v887_v9 = vadd.s32 144, %v2604_v15 }
 0x110   :  { %3793 = vst [vmem:[#allocation13_spill] sm:$0xff] %v2929_v60  ;;  %573 = vadd.xlane.f32.xlu1 %v2922_v32  ;;  %575 = vadd.xlane.f32.xlu0 %v2929_v60  ;;  %v272_v35 = vpop.xlane.xlu0 %271  ;;  %v274_v50 = vpop.xlane.xlu1 %273  ;;  %v1400_v32 = vshrl.u32 %v1336_v19, 13  ;;  %v1079_v60 = vadd.s32 %v1015_v33, %v2606_v16  ;;  %v1080_v33 = vadd.s32 %v1016_v11, %v2606_v16 }
 0x111   :  { %v2938_v13 = vpop.eup %2079  ;;  %2089 = vpow2.f32 %v459_v62  ;;  %v345_v56 = vsub.f32 %v3795_v10, %v272_v35  ;;  %v346_v30 = vsub.f32 %v3796_v53, %v274_v50  ;;  %v2960_v57 = vxor.u32 %v1590_v3, %v1526_v44 }
 0x112   :  { %3794 = vst [vmem:[#allocation14_spill] sm:$0xff] %v2938_v13  ;;  %2091 = vpow2.f32 %v461_v14  ;;  %v3799_v14 = vld [vmem:[#allocation17_spill] sm:$0xff]  ;;  %v2962_v23 = vxor.u32 %v1400_v32, %v1336_v19  ;;  %v1146_v49 = vxor.u32 %v2624_v45, %v1079_v60  ;;  %v1081_v22 = vadd.s32 %v1017_v28, %v2606_v16  ;;  %v3803_v19 = vld [vmem:[#allocation19_spill] sm:$0xff] }
 0x113   :  { %v2945_v17 = vpop.eup %2081  ;;  %v463_v2 = vmul.f32 1.442695, %v345_v56  ;;  %v465_v52 = vmul.f32 1.442695, %v346_v30  ;;  %v3800_v56 = vld [vmem:[#allocation18_spill] sm:$0xff]  ;;  %v1401_v32 = vshrl.u32 %v1337_v12, 13  ;;  %v1147_v3 = vxor.u32 %v2624_v45, %v1080_v33 }
 0x114   :  { %3797 = vst [vmem:[#allocation15_spill] sm:$0xff] %v2945_v17  ;;  %577 = vadd.xlane.f32.xlu1 %v2938_v13  ;;  %579 = vadd.xlane.f32.xlu0 %v2945_v17  ;;  %v276_v62 = vpop.xlane.xlu0 %275  ;;  %v278_v35 = vpop.xlane.xlu1 %277  ;;  %v1527_v30 = vmul.u32 3266489909, %v2942_v39  ;;  %v888_v60 = vadd.s32 152, %v2604_v15  ;;  %v1148_v44 = vxor.u32 %v2624_v45, %v1081_v22 }
 0x115   :  { %v2955_v50 = vpop.eup %2083  ;;  %2093 = vpow2.f32 %v463_v2  ;;  %v347_v10 = vsub.f32 %v3799_v14, %v276_v62  ;;  %v348_v53 = vsub.f32 %v3800_v56, %v278_v35  ;;  %v1018_v2 = vmul.u32 128, %v887_v9  ;;  %v3804_v35 = vld [vmem:[#allocation20_spill] sm:$0xff] }
 0x116   :  { %3798 = vst [vmem:[#allocation16_spill] sm:$0xff] %v2955_v50  ;;  %2095 = vpow2.f32 %v465_v52  ;;  %v1591_v14 = vshrl.u32 %v1527_v30, 16  ;;  %v1528_v56 = vmul.u32 3266489909, %v2962_v23  ;;  %v1019_v23 = vmul.u32 128, %v888_v60 }
 0x117   :  { %v2966_v41 = vpop.eup %2085  ;;  %v467_v11 = vmul.f32 1.442695, %v347_v10  ;;  %v469_v17 = vmul.f32 1.442695, %v348_v53  ;;  %v1210_v53 = vshrl.u32 %v1146_v49, 16  ;;  %v1082_v13 = vadd.s32 %v1018_v2, %v2606_v16 }
 0x118   :  { %3801 = vst [vmem:[#allocation17_spill] sm:$0xff] %v2966_v41  ;;  %581 = vadd.xlane.f32.xlu1 %v2955_v50  ;;  %583 = vadd.xlane.f32.xlu0 %v2966_v41  ;;  %v280_v62 = vpop.xlane.xlu0 %279  ;;  %v282_v39 = vpop.xlane.xlu1 %281  ;;  %v2992_v2 = vxor.u32 %v1591_v14, %v1527_v30  ;;  %v1083_v26 = vadd.s32 %v1019_v23, %v2606_v16 }
 0x119   :  { %v2973_v28 = vpop.eup %2087  ;;  %2097 = vpow2.f32 %v467_v11  ;;  %v349_v52 = vsub.f32 %v3803_v19, %v280_v62  ;;  %v350_v9 = vsub.f32 %v3804_v35, %v282_v39  ;;  %v2985_v39 = vxor.u32 %v1401_v32, %v1337_v12 }
 0x11a   :  { %3802 = vst [vmem:[#allocation18_spill] sm:$0xff] %v2973_v28  ;;  %2099 = vpow2.f32 %v469_v17  ;;  %v1211_v19 = vshrl.u32 %v1147_v3, 16  ;;  %v889_v35 = vadd.s32 160, %v2604_v15  ;;  %v3807_v17 = vld [vmem:[#allocation21_spill] sm:$0xff]  ;;  %v1274_v55 = vxor.u32 %v1210_v53, %v1146_v49 }
 0x11b   :  { %v2980_v41 = vpop.eup %2089  ;;  %v471_v33 = vmul.f32 1.442695, %v349_v52  ;;  %v473_v50 = vmul.f32 1.442695, %v350_v9  ;;  %v3808_v9 = vld [vmem:[#allocation22_spill] sm:$0xff]  ;;  %v1149_v31 = vxor.u32 %v2624_v45, %v1082_v13  ;;  %v3811_v13 = vld [vmem:[#allocation23_spill] sm:$0xff] }
 0x11c   :  { %3805 = vst [vmem:[#allocation19_spill] sm:$0xff] %v2980_v41  ;;  %585 = vadd.xlane.f32.xlu1 %v2973_v28  ;;  %587 = vadd.xlane.f32.xlu0 %v2980_v41  ;;  %v284_v11 = vpop.xlane.xlu0 %283  ;;  %v286_v62 = vpop.xlane.xlu1 %285  ;;  %v1592_v28 = vshrl.u32 %v1528_v56, 16  ;;  %v1212_v41 = vshrl.u32 %v1148_v44, 16  ;;  %v1529_v30 = vmul.u32 3266489909, %v2985_v39  ;;  %v1275_v14 = vxor.u32 %v1211_v19, %v1147_v3 }
 0x11d   :  { %v2988_v22 = vpop.eup %2091  ;;  %2101 = vpow2.f32 %v471_v33  ;;  %v351_v52 = vsub.f32 %v3807_v17, %v284_v11  ;;  %v352_v10 = vsub.f32 %v3808_v9, %v286_v62  ;;  %v1213_v49 = vshrl.u32 %v1149_v31, 16  ;;  %v3812_v17 = vld [vmem:[#allocation24_spill] sm:$0xff] }
 0x11e   :  { %3806 = vst [vmem:[#allocation20_spill] sm:$0xff] %v2988_v22  ;;  %2103 = vpow2.f32 %v473_v50  ;;  %v1020_v53 = vmul.u32 128, %v889_v35  ;;  %v3006_v9 = vxor.u32 %v1212_v41, %v1148_v44  ;;  %v1150_v19 = vxor.u32 %v2624_v45, %v1083_v26 }
 0x11f   :  { %v2995_v12 = vpop.eup %2093  ;;  %v475_v32 = vmul.f32 1.442695, %v351_v52  ;;  %v477_v60 = vmul.f32 1.442695, %v352_v10  ;;  %v1338_v52 = vmul.u32 2246822507, %v1274_v55 }
 0x120   :  { %3809 = vst [vmem:[#allocation21_spill] sm:$0xff] %v2995_v12  ;;  %589 = vadd.xlane.f32.xlu1 %v2988_v22  ;;  %591 = vadd.xlane.f32.xlu0 %v2995_v12  ;;  %v288_v33 = vpop.xlane.xlu0 %287  ;;  %v290_v11 = vpop.xlane.xlu1 %289  ;;  %v3008_v12 = vxor.u32 %v1213_v49, %v1149_v31  ;;  %v1084_v35 = vadd.s32 %v1020_v53, %v2606_v16  ;;  %v1339_v55 = vmul.u32 2246822507, %v1275_v14  ;;  %v890_v41 = vadd.s32 168, %v2604_v15 }
 0x121   :  { %v3001_v62 = vpop.eup %2095  ;;  %2105 = vpow2.f32 %v475_v32  ;;  %v353_v50 = vsub.f32 %v3811_v13, %v288_v33  ;;  %v354_v10 = vsub.f32 %v3812_v17, %v290_v11  ;;  %v3016_v32 = vxor.u32 %v1592_v28, %v1528_v56 }
 0x122   :  { %3810 = vst [vmem:[#allocation22_spill] sm:$0xff] %v3001_v62  ;;  %2107 = vpow2.f32 %v477_v60  ;;  %v1593_v60 = vshrl.u32 %v1529_v30, 16  ;;  %v1214_v44 = vshrl.u32 %v1150_v19, 16  ;;  %v1151_v33 = vxor.u32 %v2624_v45, %v1084_v35 }
 0x123   :  { %v3010_v22 = vpop.eup %2097  ;;  %v479_v3 = vmul.f32 1.442695, %v353_v50  ;;  %v481_v39 = vmul.f32 1.442695, %v354_v10  ;;  %v891_v26 = vadd.s32 176, %v2604_v15  ;;  %v1402_v11 = vshrl.u32 %v1338_v52, 13 }
 0x124   :  { %3813 = vst [vmem:[#allocation23_spill] sm:$0xff] %v3010_v22  ;;  %593 = vadd.xlane.f32.xlu1 %v3001_v62  ;;  %595 = vadd.xlane.f32.xlu0 %v3010_v22  ;;  %v3019_v31 = vpop.eup %2099  ;;  %v1340_v49 = vmul.u32 2246822507, %v3006_v9  ;;  %v1341_v53 = vmul.u32 2246822507, %v3008_v12  ;;  %v1278_v56 = vxor.u32 %v1214_v44, %v1150_v19  ;;  %v1215_v14 = vshrl.u32 %v1151_v33, 16 }
 0x125   :  { %3814 = vst [vmem:[#allocation24_spill] sm:$0xff] %v3019_v31  ;;  %2109 = vpow2.f32 %v479_v3  ;;  %v1021_v13 = vmul.u32 128, %v890_v41  ;;  %v1022_v50 = vmul.u32 128, %v891_v26  ;;  %v3029_v17 = vxor.u32 %v1593_v60, %v1529_v30 }
 0x126   :  { %2111 = vpow2.f32 %v481_v39  ;;  %v1403_v10 = vshrl.u32 %v1339_v55, 13  ;;  %v892_v3 = vadd.s32 184, %v2604_v15  ;;  %v893_v39 = vadd.s32 192, %v2604_v15 }
 0x127   :  { %v3025_v28 = vpop.eup %2101  ;;  %v1342_v12 = vmul.u32 2246822507, %v1278_v56  ;;  %v1279_v35 = vxor.u32 %v1215_v14, %v1151_v33  ;;  %v1085_v19 = vadd.s32 %v1021_v13, %v2606_v16  ;;  %v1086_v41 = vadd.s32 %v1022_v50, %v2606_v16 }
 0x128   :  { %3815 = vst [vmem:[#allocation56_spill] sm:$0xff] %v3025_v28  ;;  %597 = vadd.xlane.f32.xlu1 %v3019_v31  ;;  %599 = vadd.xlane.f32.xlu0 %v3025_v28  ;;  %v3033_v9 = vpop.eup %2103  ;;  %v3037_v44 = vxor.u32 %v1402_v11, %v1338_v52  ;;  %v1404_v26 = vshrl.u32 %v1340_v49, 13  ;;  %v1023_v23 = vmul.u32 128, %v892_v3  ;;  %v894_v30 = vadd.s32 200, %v2604_v15 }
 0x129   :  { %3816 = vst [vmem:[#allocation57_spill] sm:$0xff] %v3033_v9  ;;  %v1405_v28 = vshrl.u32 %v1341_v53, 13  ;;  %v1343_v31 = vmul.u32 2246822507, %v1279_v35  ;;  %v1152_v22 = vxor.u32 %v2624_v45, %v1085_v19  ;;  %v1153_v62 = vxor.u32 %v2624_v45, %v1086_v41 }
 0x12a   :  { %v1467_v52 = vxor.u32 %v1403_v10, %v1339_v55  ;;  %v1087_v33 = vadd.s32 %v1023_v23, %v2606_v16  ;;  %v1024_v11 = vmul.u32 128, %v893_v39  ;;  %v1025_v14 = vmul.u32 128, %v894_v30 }
 0x12b   :  { %v3040_v60 = vpop.eup %2105  ;;  %v1406_v13 = vshrl.u32 %v1342_v12, 13  ;;  %v1407_v50 = vshrl.u32 %v1343_v31, 13  ;;  %v1216_v3 = vshrl.u32 %v1152_v22, 16  ;;  %v1217_v27 = vshrl.u32 %v1153_v62, 16 }
 0x12c   :  { %3817 = vst [vmem:[#allocation58_spill] sm:$0xff] %v3040_v60  ;;  %v3044_v56 = vpop.eup %2107  ;;  %601 = vadd.xlane.f32.xlu1 %v3033_v9  ;;  %603 = vadd.xlane.f32.xlu0 %v3040_v60  ;;  %v1530_v35 = vmul.u32 3266489909, %v3037_v44  ;;  %v1154_v19 = vxor.u32 %v2624_v45, %v1087_v33  ;;  %v1088_v41 = vadd.s32 %v1024_v11, %v2606_v16  ;;  %v1531_v30 = vmul.u32 3266489909, %v1467_v52 }
 0x12d   :  { %3818 = vst [vmem:[#allocation59_spill] sm:$0xff] %v3044_v56  ;;  %v1089_v51 = vadd.s32 %v1025_v14, %v2606_v16  ;;  %v1468_v60 = vxor.u32 %v1404_v26, %v1340_v49  ;;  %v1469_v55 = vxor.u32 %v1405_v28, %v1341_v53  ;;  %v1280_v10 = vxor.u32 %v1216_v3, %v1152_v22 }
 0x12e   :  { %v1281_v23 = vxor.u32 %v1217_v27, %v1153_v62  ;;  %v1218_v44 = vshrl.u32 %v1154_v19, 16  ;;  %v1155_v33 = vxor.u32 %v2624_v45, %v1088_v41  ;;  %v1470_v63 = vxor.u32 %v1406_v13, %v1342_v12 }
 0x12f   :  { %v3053_v9 = vpop.eup %2109  ;;  %v1156_v11 = vxor.u32 %v2624_v45, %v1089_v51  ;;  %v1471_v14 = vxor.u32 %v1407_v50, %v1343_v31  ;;  %v1344_v8 = vmul.u32 2246822507, %v1280_v10  ;;  %v895_v49 = vadd.s32 208, %v2604_v15 }
 0x130   :  { %3819 = vst [vmem:[#allocation60_spill] sm:$0xff] %v3053_v9  ;;  %v3055_v39 = vpop.eup %2111  ;;  %605 = vadd.xlane.f32.xlu1 %v3044_v56  ;;  %607 = vadd.xlane.f32.xlu0 %v3053_v9  ;;  %v1594_v53 = vshrl.u32 %v1530_v35, 16  ;;  %v1345_v22 = vmul.u32 2246822507, %v1281_v23  ;;  %v1282_v27 = vxor.u32 %v1218_v44, %v1154_v19  ;;  %v1219_v62 = vshrl.u32 %v1155_v33, 16 }
 0x131   :  { %3820 = vst [vmem:[#allocation61_spill] sm:$0xff] %v3055_v39  ;;  %v1532_v28 = vmul.u32 3266489909, %v1468_v60  ;;  %v1533_v26 = vmul.u32 3266489909, %v1469_v55  ;;  %v1408_v3 = vshrl.u32 %v1344_v8, 13 }
 0x132   :  { %v1220_v56 = vshrl.u32 %v1156_v11, 16  ;;  %v1409_v52 = vshrl.u32 %v1345_v22, 13  ;;  %v1346_v9 = vmul.u32 2246822507, %v1282_v27  ;;  %v1283_v41 = vxor.u32 %v1219_v62, %v1155_v33 }
 0x133   :  { %v1026_v7 = vmul.u32 128, %v895_v49  ;;  %v1595_v51 = vshrl.u32 %v1531_v30, 16  ;;  %v1534_v12 = vmul.u32 3266489909, %v1470_v63  ;;  %v1472_v50 = vxor.u32 %v1408_v3, %v1344_v8 }
 0x134   :  { %609 = vadd.xlane.f32.xlu1 %v3055_v39  ;;  %v1535_v31 = vmul.u32 3266489909, %v1471_v14  ;;  %v1284_v13 = vxor.u32 %v1220_v56, %v1156_v11  ;;  %v1410_v10 = vshrl.u32 %v1346_v9, 13  ;;  %v1347_v48 = vmul.u32 2246822507, %v1283_v41 }
 0x135   :  { %v1090_v19 = vadd.s32 %v1026_v7, %v2606_v16  ;;  %v1596_v23 = vshrl.u32 %v1532_v28, 16  ;;  %v896_v44 = vadd.s32 216, %v2604_v15  ;;  %v1597_v39 = vshrl.u32 %v1533_v26, 16 }
 0x136   :  { %v1473_v27 = vxor.u32 %v1409_v52, %v1345_v22  ;;  %v1411_v33 = vshrl.u32 %v1347_v48, 13  ;;  %v1348_v49 = vmul.u32 2246822507, %v1284_v13  ;;  %v3067_v62 = vxor.u32 %v1594_v53, %v1530_v35 }
 0x137   :  { %v3069_v63 = vxor.u32 %v1595_v51, %v1531_v30  ;;  %v1157_v8 = vxor.u32 %v2624_v45, %v1090_v19  ;;  %v1027_v56 = vmul.u32 128, %v896_v44  ;;  %v1598_v11 = vshrl.u32 %v1534_v12, 16 }
 0x138   :  { %v1599_v7 = vshrl.u32 %v1535_v31, 16  ;;  %v1536_v14 = vmul.u32 3266489909, %v1472_v50  ;;  %v1474_v3 = vxor.u32 %v1410_v10, %v1346_v9  ;;  %v1412_v41 = vshrl.u32 %v1348_v49, 13 }
 0x139   :  { %v1221_v55 = vshrl.u32 %v1157_v8, 16  ;;  %v1091_v60 = vadd.s32 %v1027_v56, %v2606_v16  ;;  %v3074_v22 = vxor.u32 %v1596_v23, %v1532_v28  ;;  %v3076_v52 = vxor.u32 %v1597_v39, %v1533_v26 }
 0x13a   :  { %v1537_v35 = vmul.u32 3266489909, %v1473_v27  ;;  %v1475_v30 = vxor.u32 %v1411_v33, %v1347_v48  ;;  %v1028_v19 = vmul.u32 128, %v897_v43  ;;  %v3081_v50 = vxor.u32 %v1598_v11, %v1534_v12 }
 0x13b   :  { %v1285_v51 = vxor.u32 %v1221_v55, %v1157_v8  ;;  %v1158_v13 = vxor.u32 %v2624_v45, %v1091_v60  ;;  %v3083_v10 = vxor.u32 %v1599_v7, %v1535_v31  ;;  %v1600_v44 = vshrl.u32 %v1536_v14, 16 }
 0x13c   :  { %v1538_v56 = vmul.u32 3266489909, %v1474_v3  ;;  %v1476_v28 = vxor.u32 %v1412_v41, %v1348_v49  ;;  %v1092_v39 = vadd.s32 %v1028_v19, %v2606_v16  ;;  %v1601_v55 = vshrl.u32 %v1537_v35, 16 }
 0x13d   :  { %v1222_v23 = vshrl.u32 %v1158_v13, 16  ;;  %v1539_v27 = vmul.u32 3266489909, %v1475_v30  ;;  %v1349_v43 = vmul.u32 2246822507, %v1285_v51  ;;  %v898_v31 = vadd.s32 232, %v2604_v15 }
 0x13e   :  { %v1159_v12 = vxor.u32 %v2624_v45, %v1092_v39  ;;  %v3092_v11 = vxor.u32 %v1600_v44, %v1536_v14  ;;  %v1602_v7 = vshrl.u32 %v1538_v56, 16  ;;  %v1540_v3 = vmul.u32 3266489909, %v1476_v28 }
 0x13f   :  { %v1286_v33 = vxor.u32 %v1222_v23, %v1158_v13  ;;  %v1029_v19 = vmul.u32 128, %v898_v31  ;;  %v3094_v26 = vxor.u32 %v1601_v55, %v1537_v35  ;;  %v1603_v30 = vshrl.u32 %v1539_v27, 16 }
 0x140   :  { %3821 = vst [vmem:[#allocation62_spill] sm:$0xff] %v3092_v11  ;;  %v1223_v41 = vshrl.u32 %v1159_v12, 16  ;;  %v899_v51 = vadd.s32 240, %v2604_v15  ;;  %v900_v13 = vadd.s32 248, %v2604_v15  ;;  %v3823_v14 = vshrl.u32 %v2720_v36, 1 }
 0x141   :  { %v484_v60 = vpop.xlane.xlu0 %483  ;;  %3822 = vst [vmem:[#allocation63_spill] sm:$0xff] %v3094_v26  ;;  %v1350_v48 = vmul.u32 2246822507, %v1286_v33  ;;  %v1093_v49 = vadd.s32 %v1029_v19, %v2606_v16  ;;  %v3106_v31 = vxor.u32 %v1602_v7, %v1538_v56  ;;  %v1604_v9 = vshrl.u32 %v1540_v3, 16 }
 0x142   :  { %2113 = vrcp.f32 %v484_v60  ;;  %v1413_v60 = vshrl.u32 %v1349_v43, 13  ;;  %v1287_v8 = vxor.u32 %v1223_v41, %v1159_v12  ;;  %vm3101_vm0 = vcmp.ge.s32.totalorder %v3823_v14, 214748365 }
 0x143   :  { %v1030_v28 = vmul.u32 128, %v899_v51  ;;  %v1031_v55 = vmul.u32 128, %v900_v13  ;;  %v1160_v33 = vxor.u32 %v2624_v45, %v1093_v49  ;;  %v901_v41 = vadd.s32 256, %v2604_v15 }
 0x144   :  { %v1351_v53 = vmul.u32 2246822507, %v1287_v8  ;;  %v3113_v35 = vxor.u32 %v1603_v30, %v1539_v27  ;;  %v3115_v51 = vxor.u32 %v1413_v60, %v1349_v43  ;;  %v1414_v56 = vshrl.u32 %v1350_v48, 13 }
 0x145   :  { %v486_v23 = vpop.xlane.xlu1 %485  ;;  %v488_v39 = vpop.xlane.xlu0 %487  ;;  %v1094_v12 = vadd.s32 %v1030_v28, %v2606_v16  ;;  %v1095_v36 = vadd.s32 %v1031_v55, %v2606_v16  ;;  %v3826_v7 = vshrl.u32 %v2745_v40, 1  ;;  %v1224_v49 = vshrl.u32 %v1160_v33, 16 }
 0x146   :  { %2115 = vrcp.f32 %v486_v23  ;;  %v3829_v28 = vshrl.u32 %v2760_v47, 1  ;;  %v1730_v43 = vshrl.u32 %v3106_v31, 1  ;;  %v3132_v40 = vxor.u32 %v1604_v9, %v1540_v3  ;;  %v3907_v31 = vld [vmem:[#allocation33_spill] sm:$0xff] }
 0x147   :  { %2117 = vrcp.f32 %v488_v39  ;;  %vm3119_vm1 = vcmp.ge.s32.totalorder %v3826_v7, 214748365  ;;  %v1161_v13 = vxor.u32 %v2624_v45, %v1094_v12  ;;  %v1162_v39 = vxor.u32 %v2624_v45, %v1095_v36 }
 0x148   :  { %vm3127_vm2 = vcmp.ge.s32.totalorder %v3829_v28, 214748365  ;;  %v1415_v30 = vshrl.u32 %v1351_v53, 13  ;;  %v1288_v55 = vxor.u32 %v1224_v49, %v1160_v33  ;;  %v1032_v23 = vmul.u32 128, %v901_v41 }
 0x149   :  { %v490_v19 = vpop.xlane.xlu1 %489  ;;  %v492_v14 = vpop.xlane.xlu0 %491  ;;  %v1226_v7 = vshrl.u32 %v1162_v39, 16  ;;  %v1541_v28 = vmul.u32 3266489909, %v3115_v51  ;;  %v3136_v11 = vxor.u32 %v1414_v56, %v1350_v48  ;;  %v1732_v48 = vshrl.u32 %v3132_v40, 1 }
 0x14a   :  { %2119 = vrcp.f32 %v490_v19  ;;  %v1225_v19 = vshrl.u32 %v1161_v13, 16  ;;  %v1352_v3 = vmul.u32 2246822507, %v1288_v55 }
 0x14b   :  { %2121 = vrcp.f32 %v492_v14  ;;  %v3832_v14 = vshrl.u32 %v2791_v24, 1  ;;  %v1290_v49 = vxor.u32 %v1226_v7, %v1162_v39  ;;  %v3152_v24 = vxor.u32 %v1415_v30, %v1351_v53 }
 0x14c   :  { %v2114_v60 = vpop.eup %2113  ;;  %v1289_v33 = vxor.u32 %v1225_v19, %v1161_v13  ;;  %v1416_v56 = vshrl.u32 %v1352_v3, 13  ;;  %v1096_v13 = vadd.s32 %v1032_v23, %v2606_v16  ;;  %v1605_v7 = vshrl.u32 %v1541_v28, 16 }
 0x14d   :  { %v739_v12 = vmul.f32 1.1111112, %v2114_v60  ;;  %v494_v26 = vpop.xlane.xlu1 %493  ;;  %v496_v36 = vpop.xlane.xlu0 %495  ;;  %vm3140_vm3 = vcmp.ge.s32.totalorder %v3832_v14, 214748365  ;;  %v3835_v60 = vshrl.u32 %v2821_v25, 1  ;;  %v3838_v53 = vshrl.u32 %v2871_v46, 1 }
 0x14e   :  { %2123 = vrcp.f32 %v494_v26  ;;  %v1353_v14 = vmul.u32 2246822507, %v1289_v33  ;;  %v1354_v26 = vmul.u32 2246822507, %v1290_v49  ;;  %v1480_v23 = vxor.u32 %v1416_v56, %v1352_v3 }
 0x14f   :  { %v803_v41 = vmul.f32 %v2597_v34, %v739_v12  ;;  %vm3147_vm4 = vcmp.ge.s32.totalorder %v3835_v60, 214748365  ;;  %2125 = vrcp.f32 %v496_v36  ;;  %v1542_v12 = vmul.u32 3266489909, %v3136_v11 }
 0x150   :  { %v2116_v51 = vpop.eup %2115  ;;  %vm3160_vm5 = vcmp.ge.s32.totalorder %v3838_v53, 214748365  ;;  %v1417_v33 = vshrl.u32 %v1353_v14, 13  ;;  %v3841_v49 = vshrl.u32 %v2882_v6, 1  ;;  %v1543_v11 = vmul.u32 3266489909, %v3152_v24 }
 0x151   :  { %v2118_v39 = vpop.eup %2117  ;;  %v1835_v34 = vsel %vm3101_vm0, %v803_v41, 0.0  ;;  %v740_v25 = vmul.f32 1.1111112, %v2116_v51  ;;  %v498_v55 = vpop.xlane.xlu1 %497  ;;  %v1418_v60 = vshrl.u32 %v1354_v26, 13  ;;  %v902_v3 = vadd.s32 264, %v2604_v15 }
 0x152   :  { %v500_v19 = vpop.xlane.xlu0 %499  ;;  %1899 = vst [vmem:[#allocation7] sm:$0xff] %v1835_v34  ;;  %v741_v36 = vmul.f32 1.1111112, %v2118_v39  ;;  %2127 = vrcp.f32 %v498_v55  ;;  %vm3167_vm6 = vcmp.ge.s32.totalorder %v3841_v49, 214748365  ;;  %v1163_v34 = vxor.u32 %v2624_v45, %v1096_v13 }
 0x153   :  { %v804_v44 = vmul.f32 %v2608_v42, %v740_v25  ;;  %2129 = vrcp.f32 %v500_v19  ;;  %v1544_v39 = vmul.u32 3266489909, %v1480_v23  ;;  %v1606_v53 = vshrl.u32 %v1542_v12, 16 }
 0x154   :  { %v2120_v46 = vpop.eup %2119  ;;  %v805_v51 = vmul.f32 %v2600_v21, %v741_v36  ;;  %v3177_v19 = vxor.u32 %v1417_v33, %v1353_v14  ;;  %v3844_v36 = vshrl.u32 %v2908_v38, 1  ;;  %v3187_v8 = vxor.u32 %v1605_v7, %v1541_v28 }
 0x155   :  { %v2122_v56 = vpop.eup %2121  ;;  %v1836_v42 = vsel %vm3119_vm1, %v804_v44, 0.0  ;;  %v742_v6 = vmul.f32 1.1111112, %v2120_v46  ;;  %v502_v25 = vpop.xlane.xlu1 %501  ;;  %v3847_v14 = vshrl.u32 %v2910_v59, 1  ;;  %v1607_v27 = vshrl.u32 %v1543_v11, 16 }
 0x156   :  { %v504_v55 = vpop.xlane.xlu0 %503  ;;  %1900 = vst [vmem:[#allocation7 + $0x8] sm:$0xff] %v1836_v42  ;;  %v1837_v24 = vsel %vm3127_vm2, %v805_v51, 0.0  ;;  %v743_v21 = vmul.f32 1.1111112, %v2122_v56  ;;  %vm3183_vm7 = vcmp.ge.s32.totalorder %v3844_v36, 214748365  ;;  %2131 = vrcp.f32 %v502_v25 }
 0x157   :  { %1901 = vst [vmem:[#allocation7 + $0x10] sm:$0xff] %v1837_v24  ;;  %v806_v23 = vmul.f32 %v2616_v37, %v742_v6  ;;  %vm3192_vm8 = vcmp.ge.s32.totalorder %v3847_v14, 214748365  ;;  %2133 = vrcp.f32 %v504_v55  ;;  %v3196_v44 = vxor.u32 %v1418_v60, %v1354_v26 }
 0x158   :  { %v2124_v38 = vpop.eup %2123  ;;  %v807_v49 = vmul.f32 %v2622_v61, %v743_v21  ;;  %v1608_v46 = vshrl.u32 %v1544_v39, 16  ;;  %v1227_v51 = vshrl.u32 %v1163_v34, 16  ;;  %v1033_v28 = vmul.u32 128, %v902_v3 }
 0x159   :  { %v2126_v7 = vpop.eup %2125  ;;  %v1838_v37 = vsel %vm3140_vm3, %v806_v23, 0.0  ;;  %v744_v56 = vmul.f32 1.1111112, %v2124_v38  ;;  %v506_v59 = vpop.xlane.xlu1 %505  ;;  %v3201_v6 = vxor.u32 %v1606_v53, %v1542_v12  ;;  %v1545_v25 = vmul.u32 3266489909, %v3177_v19 }
 0x15a   :  { %v508_v42 = vpop.xlane.xlu0 %507  ;;  %1902 = vst [vmem:[#allocation7 + $0x18] sm:$0xff] %v1838_v37  ;;  %v1839_v26 = vsel %vm3147_vm4, %v807_v49, 0.0  ;;  %v745_v60 = vmul.f32 1.1111112, %v2126_v7  ;;  %v3850_v61 = vshrl.u32 %v2931_v0, 1  ;;  %2135 = vrcp.f32 %v506_v59 }
 0x15b   :  { %v1733_v9 = vshrl.u32 %v3187_v8, 1  ;;  %1903 = vst [vmem:[#allocation7 + $0x20] sm:$0xff] %v1839_v26  ;;  %v808_v12 = vmul.f32 %v2629_v29, %v744_v56  ;;  %v3853_v55 = vshrl.u32 %v2950_v54, 1  ;;  %2137 = vrcp.f32 %v508_v42  ;;  %v3863_v56 = vld [vmem:[#allocation26_spill] sm:$0xff] }
 0x15c   :  { %vm3208_vm9 = vcmp.ge.s32.totalorder %v3850_v61, 214748365  ;;  %v3220_v47 = vxor.u32 %v1607_v27, %v1543_v11  ;;  %v1546_v0 = vmul.u32 3266489909, %v3196_v44  ;;  %v2128_v19 = vpop.eup %2127  ;;  %v809_v24 = vmul.f32 %v2634_v5, %v745_v60 }
 0x15d   :  { %vm3216_vm10 = vcmp.ge.s32.totalorder %v3853_v55, 214748365  ;;  %v3224_v21 = vxor.u32 %v1608_v46, %v1544_v39  ;;  %v3226_v36 = vxor.u32 %v1227_v51, %v1163_v34  ;;  %v1097_v29 = vadd.s32 %v1033_v28, %v2606_v16  ;;  %v2130_v23 = vpop.eup %2129  ;;  %v510_v38 = vpop.xlane.xlu1 %509  ;;  %v3859_v46 = vld [vmem:[#allocation25_spill] sm:$0xff] }
 0x15e   :  { %v1840_v54 = vsel %vm3160_vm5, %v808_v12, 0.0  ;;  %v746_v14 = vmul.f32 1.1111112, %v2128_v19  ;;  %v512_v49 = vpop.xlane.xlu0 %511  ;;  %v1734_v11 = vshrl.u32 %v3201_v6, 1  ;;  %v1609_v27 = vshrl.u32 %v1545_v25, 16 }
 0x15f   :  { %1904 = vst [vmem:[#allocation7 + $0x28] sm:$0xff] %v1840_v54  ;;  %v1841_v5 = vsel %vm3167_vm6, %v809_v24, 0.0  ;;  %v747_v39 = vmul.f32 1.1111112, %v2130_v23  ;;  %v3856_v34 = vshrl.u32 %v2960_v57, 1  ;;  %2139 = vrcp.f32 %v510_v38 }
 0x160   :  { %v1355_v30 = vmul.u32 2246822507, %v3226_v36  ;;  %1905 = vst [vmem:[#allocation7 + $0x30] sm:$0xff] %v1841_v5  ;;  %v810_v51 = vmul.f32 %v3859_v46, %v746_v14  ;;  %v3860_v28 = vshrl.u32 %v2992_v2, 1  ;;  %2141 = vrcp.f32 %v512_v49  ;;  %v2132_v37 = vpop.eup %2131  ;;  %v3886_v14 = vld [vmem:[#allocation28_spill] sm:$0xff] }
 0x161   :  { %vm3236_vm11 = vcmp.ge.s32.totalorder %v3856_v34, 214748365  ;;  %v1735_v41 = vshrl.u32 %v3220_v47, 1  ;;  %v1610_v57 = vshrl.u32 %v1546_v0, 16  ;;  %v811_v59 = vmul.f32 %v3863_v56, %v747_v39  ;;  %v2134_v61 = vpop.eup %2133  ;;  %v514_v55 = vpop.xlane.xlu1 %513 }
 0x162   :  { %vm3244_vm12 = vcmp.ge.s32.totalorder %v3860_v28, 214748365  ;;  %v1736_v42 = vshrl.u32 %v3224_v21, 1  ;;  %v1164_v26 = vxor.u32 %v2624_v45, %v1097_v29  ;;  %v903_v60 = vadd.s32 272, %v2604_v15  ;;  %v516_v19 = vpop.xlane.xlu0 %515 }
 0x163   :  { %v1842_v2 = vsel %vm3183_vm7, %v810_v51, 0.0  ;;  %v748_v12 = vmul.f32 1.1111112, %v2132_v37  ;;  %v3255_v24 = vxor.u32 %v1609_v27, %v1545_v25  ;;  %v904_v36 = vadd.s32 280, %v2604_v15 }
 0x164   :  { %1906 = vst [vmem:[#allocation7 + $0x38] sm:$0xff] %v1842_v2  ;;  %v1843_v23 = vsel %vm3192_vm8, %v811_v59, 0.0  ;;  %v749_v54 = vmul.f32 1.1111112, %v2134_v61  ;;  %v3864_v29 = vshrl.u32 %v3016_v32, 1  ;;  %2143 = vrcp.f32 %v514_v55  ;;  %v2136_v5 = vpop.eup %2135  ;;  %v3876_v55 = vld [vmem:[#allocation27_spill] sm:$0xff] }
 0x165   :  { %v1419_v13 = vshrl.u32 %v1355_v30, 13  ;;  %1907 = vst [vmem:[#allocation7 + $0x40] sm:$0xff] %v1843_v23  ;;  %v812_v38 = vmul.f32 %v2650_v18, %v748_v12  ;;  %v3867_v25 = vshrl.u32 %v3029_v17, 1  ;;  %2145 = vrcp.f32 %v516_v19  ;;  %v2138_v51 = vpop.eup %2137  ;;  %v518_v28 = vpop.xlane.xlu1 %517 }
 0x166   :  { %vm3262_vm13 = vcmp.ge.s32.totalorder %v3864_v29, 214748365  ;;  %v1228_v33 = vshrl.u32 %v1164_v26, 16  ;;  %v1034_v27 = vmul.u32 128, %v903_v60  ;;  %v813_v32 = vmul.f32 %v2654_v1, %v749_v54  ;;  %v520_v37 = vpop.xlane.xlu0 %519 }
 0x167   :  { %vm3269_vm14 = vcmp.ge.s32.totalorder %v3867_v25, 214748365  ;;  %v3274_v39 = vxor.u32 %v1610_v57, %v1546_v0  ;;  %v1035_v34 = vmul.u32 128, %v904_v36  ;;  %v905_v46 = vadd.s32 288, %v2604_v15  ;;  %v3895_v57 = vld [vmem:[#allocation30_spill] sm:$0xff] }
 0x168   :  { %v1844_v18 = vsel %vm3208_vm9, %v812_v38, 0.0  ;;  %v750_v17 = vmul.f32 1.1111112, %v2136_v5  ;;  %v1292_v56 = vxor.u32 %v1228_v33, %v1164_v26  ;;  %v1098_v59 = vadd.s32 %v1034_v27, %v2606_v16 }
 0x169   :  { %1908 = vst [vmem:[#allocation7 + $0x48] sm:$0xff] %v1844_v18  ;;  %v1845_v60 = vsel %vm3216_vm10, %v813_v32, 0.0  ;;  %v751_v1 = vmul.f32 1.1111112, %v2138_v51  ;;  %v3870_v0 = vshrl.u32 %v3067_v62, 1  ;;  %2147 = vrcp.f32 %v518_v28  ;;  %v2140_v12 = vpop.eup %2139  ;;  %v522_v29 = vpop.xlane.xlu1 %521 }
 0x16a   :  { %v3288_v3 = vxor.u32 %v1419_v13, %v1355_v30  ;;  %1909 = vst [vmem:[#allocation7 + $0x50] sm:$0xff] %v1845_v60  ;;  %v814_v61 = vmul.f32 %v2659_v58, %v750_v17  ;;  %v3873_v26 = vshrl.u32 %v3069_v63, 1  ;;  %2149 = vrcp.f32 %v520_v37  ;;  %v2142_v54 = vpop.eup %2141  ;;  %v524_v13 = vpop.xlane.xlu0 %523 }
 0x16b   :  { %vm3284_vm15 = vcmp.ge.s32.totalorder %v3870_v0, 214748365  ;;  %v1356_v53 = vmul.u32 2246822507, %v1292_v56  ;;  %v1165_v62 = vxor.u32 %v2624_v45, %v1098_v59  ;;  %v815_v19 = vmul.f32 %v3876_v55, %v751_v1 }
 0x16c   :  { %vm3293_vm0 = vcmp.ge.s32.totalorder %v3873_v26, 214748365  ;;  %v1099_v36 = vadd.s32 %v1035_v34, %v2606_v16  ;;  %v1036_v30 = vmul.u32 128, %v905_v46  ;;  %v906_v23 = vadd.s32 296, %v2604_v15 }
 0x16d   :  { %v1846_v58 = vsel %vm3236_vm11, %v814_v61, 0.0  ;;  %v752_v63 = vmul.f32 1.1111112, %v2140_v12  ;;  %v1420_v38 = vshrl.u32 %v1356_v53, 13  ;;  %v1229_v25 = vshrl.u32 %v1165_v62, 16  ;;  %v526_v60 = vpop.xlane.xlu1 %525 }
 0x16e   :  { %1910 = vst [vmem:[#allocation7 + $0x58] sm:$0xff] %v1846_v58  ;;  %v1847_v33 = vsel %vm3244_vm12, %v815_v19, 0.0  ;;  %v753_v27 = vmul.f32 1.1111112, %v2142_v54  ;;  %v3877_v5 = vshrl.u32 %v3074_v22, 1  ;;  %2151 = vrcp.f32 %v522_v29  ;;  %v2144_v22 = vpop.eup %2143  ;;  %v528_v1 = vpop.xlane.xlu0 %527 }
 0x16f   :  { %v1547_v44 = vmul.u32 3266489909, %v3288_v3  ;;  %1911 = vst [vmem:[#allocation7 + $0x60] sm:$0xff] %v1847_v33  ;;  %v816_v34 = vmul.f32 %v2669_v20, %v752_v63  ;;  %v3880_v46 = vshrl.u32 %v3076_v52, 1  ;;  %2153 = vrcp.f32 %v524_v13  ;;  %v2146_v59 = vpop.eup %2145 }
 0x170   :  { %vm3307_vm1 = vcmp.ge.s32.totalorder %v3877_v5, 214748365  ;;  %v1484_v7 = vxor.u32 %v1420_v38, %v1356_v53  ;;  %v1293_v18 = vxor.u32 %v1229_v25, %v1165_v62  ;;  %v817_v17 = vmul.f32 %v2673_v4, %v753_v27 }
 0x171   :  { %vm3315_vm2 = vcmp.ge.s32.totalorder %v3880_v46, 214748365  ;;  %v1737_v28 = vshrl.u32 %v3255_v24, 1  ;;  %v1166_v37 = vxor.u32 %v2624_v45, %v1099_v36  ;;  %v1100_v56 = vadd.s32 %v1036_v30, %v2606_v16  ;;  %v530_v38 = vpop.xlane.xlu1 %529  ;;  %v3891_v46 = vld [vmem:[#allocation62_spill] sm:$0xff] }
 0x172   :  { %v1848_v20 = vsel %vm3262_vm13, %v816_v34, 0.0  ;;  %v754_v52 = vmul.f32 1.1111112, %v2144_v22  ;;  %v1548_v0 = vmul.u32 3266489909, %v1484_v7  ;;  %v1037_v3 = vmul.u32 128, %v906_v23  ;;  %v532_v25 = vpop.xlane.xlu0 %531 }
 0x173   :  { %1912 = vst [vmem:[#allocation7 + $0x68] sm:$0xff] %v1848_v20  ;;  %v1849_v61 = vsel %vm3269_vm14, %v817_v17, 0.0  ;;  %v755_v4 = vmul.f32 1.1111112, %v2146_v59  ;;  %v3883_v26 = vshrl.u32 %v3081_v50, 1  ;;  %2155 = vrcp.f32 %v526_v60  ;;  %v2148_v30 = vpop.eup %2147  ;;  %v3890_v50 = vld [vmem:[#allocation29_spill] sm:$0xff] }
 0x174   :  { %v1357_v62 = vmul.u32 2246822507, %v1293_v18  ;;  %1913 = vst [vmem:[#allocation7 + $0x70] sm:$0xff] %v1849_v61  ;;  %v818_v12 = vmul.f32 %v3886_v14, %v754_v52  ;;  %v3887_v55 = vshrl.u32 %v3083_v10, 1  ;;  %2157 = vrcp.f32 %v528_v1  ;;  %v2150_v29 = vpop.eup %2149  ;;  %v3900_v60 = vld [vmem:[#allocation31_spill] sm:$0xff]  ;;  %v3916_v18 = vld [vmem:[#allocation36_spill] sm:$0xff] }
 0x175   :  { %vm3329_vm3 = vcmp.ge.s32.totalorder %v3883_v26, 214748365  ;;  %v1611_v49 = vshrl.u32 %v1547_v44, 16  ;;  %v1230_v36 = vshrl.u32 %v1166_v37, 16  ;;  %v819_v23 = vmul.f32 %v3890_v50, %v755_v4 }
 0x176   :  { %vm3336_vm4 = vcmp.ge.s32.totalorder %v3887_v55, 214748365  ;;  %v1421_v54 = vshrl.u32 %v1357_v62, 13  ;;  %v1167_v58 = vxor.u32 %v2624_v45, %v1100_v56  ;;  %v1101_v63 = vadd.s32 %v1037_v3, %v2606_v16  ;;  %v3896_v56 = vld [vmem:[#allocation63_spill] sm:$0xff]  ;;  %v536_v55 = vpop.xlane.xlu0 %535 }
 0x177   :  { %v1850_v13 = vsel %vm3284_vm15, %v818_v12, 0.0  ;;  %v756_v10 = vmul.f32 1.1111112, %v2148_v30  ;;  %v1612_v33 = vshrl.u32 %v1548_v0, 16  ;;  %v1294_v27 = vxor.u32 %v1230_v36, %v1166_v37  ;;  %v534_v12 = vpop.xlane.xlu1 %533 }
 0x178   :  { %1914 = vst [vmem:[#allocation7 + $0x78] sm:$0xff] %v1850_v13  ;;  %v1851_v5 = vsel %vm3293_vm0, %v819_v23, 0.0  ;;  %v757_v34 = vmul.f32 1.1111112, %v2150_v29  ;;  %v3892_v7 = vshrl.u32 %v3891_v46, 1  ;;  %2159 = vrcp.f32 %v530_v38  ;;  %v2152_v52 = vpop.eup %2151  ;;  %v3903_v23 = vld [vmem:[#allocation32_spill] sm:$0xff] }
 0x179   :  { %v1485_v22 = vxor.u32 %v1421_v54, %v1357_v62  ;;  %1915 = vst [vmem:[#allocation7 + $0x80] sm:$0xff] %v1851_v5  ;;  %v820_v17 = vmul.f32 %v3895_v57, %v756_v10  ;;  %v3897_v59 = vshrl.u32 %v3896_v56, 1  ;;  %2161 = vrcp.f32 %v532_v25  ;;  %v2154_v26 = vpop.eup %2153  ;;  %v3928_v57 = vld [vmem:[#allocation40_spill] sm:$0xff] }
 0x17a   :  { %vm3349_vm5 = vcmp.ge.s32.totalorder %v3892_v7, 214748365  ;;  %v3360_v2 = vxor.u32 %v1611_v49, %v1547_v44  ;;  %v1358_v20 = vmul.u32 2246822507, %v1294_v27  ;;  %v821_v1 = vmul.f32 %v3900_v60, %v757_v34  ;;  %v540_v34 = vpop.xlane.xlu0 %539 }
 0x17b   :  { %vm3356_vm6 = vcmp.ge.s32.totalorder %v3897_v59, 214748365  ;;  %v1549_v3 = vmul.u32 3266489909, %v1485_v22  ;;  %v1231_v61 = vshrl.u32 %v1167_v58, 16  ;;  %v1168_v4 = vxor.u32 %v2624_v45, %v1101_v63  ;;  %v538_v5 = vpop.xlane.xlu1 %537 }
 0x17c   :  { %v1852_v62 = vsel %vm3307_vm1, %v820_v17, 0.0  ;;  %v758_v14 = vmul.f32 1.1111112, %v2152_v52  ;;  %v3366_v36 = vxor.u32 %v1612_v33, %v1548_v0  ;;  %v1422_v30 = vshrl.u32 %v1358_v20, 13  ;;  %v3910_v17 = vld [vmem:[#allocation34_spill] sm:$0xff] }
 0x17d   :  { %1916 = vst [vmem:[#allocation7 + $0x88] sm:$0xff] %v1852_v62  ;;  %v1853_v44 = vsel %vm3315_vm2, %v821_v1, 0.0  ;;  %v759_v49 = vmul.f32 1.1111112, %v2154_v26  ;;  %vm3372_vm7 = vcmp.ge.s32.totalorder %v1730_v43, 214748365  ;;  %2163 = vrcp.f32 %v534_v12  ;;  %v2156_v13 = vpop.eup %2155 }
 0x17e   :  { %v1613_v32 = vshrl.u32 %v1549_v3, 16  ;;  %1917 = vst [vmem:[#allocation7 + $0x90] sm:$0xff] %v1853_v44  ;;  %v822_v54 = vmul.f32 %v3903_v23, %v758_v14  ;;  %v3904_v0 = vshrl.u32 %v3113_v35, 1  ;;  %2165 = vrcp.f32 %v536_v55  ;;  %v2158_v33 = vpop.eup %2157  ;;  %v544_v14 = vpop.xlane.xlu0 %543 }
 0x17f   :  { %v1486_v51 = vxor.u32 %v1422_v30, %v1358_v20  ;;  %v1295_v29 = vxor.u32 %v1231_v61, %v1167_v58  ;;  %v823_v43 = vmul.f32 %v3907_v31, %v759_v49  ;;  %v1738_v10 = vshrl.u32 %v3274_v39, 1  ;;  %v3913_v20 = vld [vmem:[#allocation35_spill] sm:$0xff] }
 0x180   :  { %vm3379_vm8 = vcmp.ge.s32.totalorder %v3904_v0, 214748365  ;;  %v1232_v38 = vshrl.u32 %v1168_v4, 16  ;;  %v907_v25 = vadd.s32 304, %v2604_v15  ;;  %v1854_v27 = vsel %vm3329_vm3, %v822_v54, 0.0 }
 0x181   :  { %v760_v35 = vmul.f32 1.1111112, %v2156_v13  ;;  %v1739_v46 = vshrl.u32 %v3360_v2, 1  ;;  %v1550_v7 = vmul.u32 3266489909, %v1486_v51  ;;  %1918 = vst [vmem:[#allocation7 + $0x98] sm:$0xff] %v1854_v27  ;;  %2167 = vrcp.f32 %v538_v5 }
 0x182   :  { %v1855_v58 = vsel %vm3336_vm4, %v823_v43, 0.0  ;;  %v761_v22 = vmul.f32 1.1111112, %v2158_v33  ;;  %vm3393_vm9 = vcmp.ge.s32.totalorder %v1732_v48, 214748365  ;;  %v1740_v53 = vshrl.u32 %v3366_v36, 1  ;;  %v2160_v48 = vpop.eup %2159  ;;  %v548_v43 = vpop.xlane.xlu0 %547 }
 0x183   :  { %1919 = vst [vmem:[#allocation7 + $0xa0] sm:$0xff] %v1855_v58  ;;  %v824_v56 = vmul.f32 %v3910_v17, %v760_v35  ;;  %vm3401_vm10 = vcmp.ge.s32.totalorder %v1733_v9, 214748365  ;;  %2169 = vrcp.f32 %v540_v34  ;;  %v3405_v19 = vxor.u32 %v1613_v32, %v1549_v3  ;;  %v2162_v26 = vpop.eup %2161  ;;  %v542_v9 = vpop.xlane.xlu1 %541  ;;  %v3922_v5 = vld [vmem:[#allocation38_spill] sm:$0xff] }
 0x184   :  { %v1359_v40 = vmul.u32 2246822507, %v1295_v29  ;;  %v825_v52 = vmul.f32 %v3913_v20, %v761_v22  ;;  %v1296_v60 = vxor.u32 %v1232_v38, %v1168_v4  ;;  %v1038_v1 = vmul.u32 128, %v907_v25  ;;  %v3934_v4 = vld [vmem:[#allocation42_spill] sm:$0xff] }
 0x185   :  { %v908_v61 = vadd.s32 312, %v2604_v15  ;;  %v1856_v62 = vsel %vm3349_vm5, %v824_v56, 0.0  ;;  %v762_v8 = vmul.f32 1.1111112, %v2160_v48  ;;  %v1614_v12 = vshrl.u32 %v1550_v7, 16 }
 0x186   :  { %v1423_v55 = vshrl.u32 %v1359_v40, 13  ;;  %1920 = vst [vmem:[#allocation7 + $0xa8] sm:$0xff] %v1856_v62  ;;  %v1857_v3 = vsel %vm3356_vm6, %v825_v52, 0.0  ;;  %v763_v30 = vmul.f32 1.1111112, %v2162_v26  ;;  %2171 = vrcp.f32 %v542_v9  ;;  %v552_v52 = vpop.xlane.xlu0 %551 }
 0x187   :  { %vm3415_vm11 = vcmp.ge.s32.totalorder %v1734_v11, 214748365  ;;  %v1360_v44 = vmul.u32 2246822507, %v1296_v60  ;;  %1921 = vst [vmem:[#allocation7 + $0xb0] sm:$0xff] %v1857_v3  ;;  %v826_v49 = vmul.f32 %v3916_v18, %v762_v8  ;;  %2173 = vrcp.f32 %v544_v14  ;;  %v2164_v6 = vpop.eup %2163  ;;  %v3919_v11 = vld [vmem:[#allocation37_spill] sm:$0xff] }
 0x188   :  { %vm3422_vm12 = vcmp.ge.s32.totalorder %v1735_v41, 214748365  ;;  %v1741_v37 = vshrl.u32 %v3405_v19, 1  ;;  %v1487_v23 = vxor.u32 %v1423_v55, %v1359_v40  ;;  %v827_v54 = vmul.f32 %v3919_v11, %v763_v30  ;;  %v2166_v13 = vpop.eup %2165  ;;  %v546_v41 = vpop.xlane.xlu1 %545  ;;  %v3929_v3 = vld [vmem:[#allocation41_spill] sm:$0xff] }
 0x189   :  { %v1424_v0 = vshrl.u32 %v1360_v44, 13  ;;  %v1102_v51 = vadd.s32 %v1038_v1, %v2606_v16  ;;  %v1039_v29 = vmul.u32 128, %v908_v61  ;;  %v1858_v31 = vsel %vm3372_vm7, %v826_v49, 0.0 }
 0x18a   :  { %v764_v47 = vmul.f32 1.1111112, %v2164_v6  ;;  %v3431_v38 = vxor.u32 %v1614_v12, %v1550_v7  ;;  %v909_v25 = vadd.s32 320, %v2604_v15  ;;  %1922 = vst [vmem:[#allocation7 + $0xb8] sm:$0xff] %v1858_v31  ;;  %v1859_v33 = vsel %vm3379_vm8, %v827_v54, 0.0  ;;  %v556_v6 = vpop.xlane.xlu0 %555  ;;  %v3943_v7 = vld [vmem:[#allocation45_spill] sm:$0xff] }
 0x18b   :  { %v765_v27 = vmul.f32 1.1111112, %v2166_v13  ;;  %vm3438_vm13 = vcmp.ge.s32.totalorder %v1736_v42, 214748365  ;;  %2175 = vrcp.f32 %v546_v41  ;;  %v1551_v50 = vmul.u32 3266489909, %v1487_v23  ;;  %v2168_v21 = vpop.eup %2167 }
 0x18c   :  { %1923 = vst [vmem:[#allocation7 + $0xc0] sm:$0xff] %v1859_v33  ;;  %v828_v34 = vmul.f32 %v3922_v5, %v764_v47  ;;  %vm3445_vm14 = vcmp.ge.s32.totalorder %v1737_v28, 214748365  ;;  %2177 = vrcp.f32 %v548_v43  ;;  %v1488_v63 = vxor.u32 %v1424_v0, %v1360_v44  ;;  %v3925_v42 = vld [vmem:[#allocation39_spill] sm:$0xff]  ;;  %v550_v28 = vpop.xlane.xlu1 %549 }
 0x18d   :  { %v1169_v58 = vxor.u32 %v2624_v45, %v1102_v51  ;;  %v829_v22 = vmul.f32 %v3925_v42, %v765_v27  ;;  %v1615_v17 = vshrl.u32 %v1551_v50, 16  ;;  %v1103_v56 = vadd.s32 %v1039_v29, %v2606_v16  ;;  %v2170_v48 = vpop.eup %2169  ;;  %v3940_v42 = vld [vmem:[#allocation44_spill] sm:$0xff] }
 0x18e   :  { %v1040_v40 = vmul.u32 128, %v909_v25  ;;  %v1860_v20 = vsel %vm3393_vm9, %v828_v34, 0.0  ;;  %v766_v24 = vmul.f32 1.1111112, %v2168_v21  ;;  %v1552_v60 = vmul.u32 3266489909, %v1488_v63  ;;  %v560_v5 = vpop.xlane.xlu0 %559 }
 0x18f   :  { %v1233_v1 = vshrl.u32 %v1169_v58, 16  ;;  %1924 = vst [vmem:[#allocation7 + $0xc8] sm:$0xff] %v1860_v20  ;;  %v1861_v61 = vsel %vm3401_vm10, %v829_v22, 0.0  ;;  %v767_v26 = vmul.f32 1.1111112, %v2170_v48  ;;  %2179 = vrcp.f32 %v550_v28 }
 0x190   :  { %vm3458_vm15 = vcmp.ge.s32.totalorder %v1738_v10, 214748365  ;;  %v1679_v8 = vxor.u32 %v1615_v17, %v1551_v50  ;;  %1925 = vst [vmem:[#allocation7 + $0xd0] sm:$0xff] %v1861_v61  ;;  %v830_v9 = vmul.f32 %v3928_v57, %v766_v24  ;;  %2181 = vrcp.f32 %v552_v52  ;;  %v2172_v55 = vpop.eup %2171  ;;  %v554_v23 = vpop.xlane.xlu1 %553 }
 0x191   :  { %v1616_v14 = vshrl.u32 %v1552_v60, 16  ;;  %v1297_v12 = vxor.u32 %v1233_v1, %v1169_v58  ;;  %v831_v30 = vmul.f32 %v3929_v3, %v767_v26  ;;  %vm3466_vm0 = vcmp.ge.s32.totalorder %v1739_v46, 214748365  ;;  %v2174_v44 = vpop.eup %2173  ;;  %v3946_v3 = vld [vmem:[#allocation46_spill] sm:$0xff] }
 0x192   :  { %v1170_v39 = vxor.u32 %v2624_v45, %v1103_v56  ;;  %v1104_v10 = vadd.s32 %v1040_v40, %v2606_v16  ;;  %v1862_v18 = vsel %vm3415_vm11, %v830_v9, 0.0  ;;  %v768_v49 = vmul.f32 1.1111112, %v2172_v55  ;;  %v564_v57 = vpop.xlane.xlu0 %563 }
 0x193   :  { %v1680_v11 = vxor.u32 %v1616_v14, %v1552_v60  ;;  %v1361_v54 = vmul.u32 2246822507, %v1297_v12  ;;  %1926 = vst [vmem:[#allocation7 + $0xd8] sm:$0xff] %v1862_v18  ;;  %v1863_v2 = vsel %vm3422_vm12, %v831_v30, 0.0  ;;  %v769_v46 = vmul.f32 1.1111112, %v2174_v44 }
 0x194   :  { %vm3478_vm1 = vcmp.ge.s32.totalorder %v1740_v53, 214748365  ;;  %v1742_v51 = vshrl.u32 %v3431_v38, 1  ;;  %2183 = vrcp.f32 %v554_v23  ;;  %1927 = vst [vmem:[#allocation7 + $0xe0] sm:$0xff] %v1863_v2  ;;  %v832_v29 = vmul.f32 %v3934_v4, %v768_v49  ;;  %v3937_v53 = vld [vmem:[#allocation43_spill] sm:$0xff]  ;;  %v558_v27 = vpop.xlane.xlu1 %557 }
 0x195   :  { %vm3486_vm2 = vcmp.ge.s32.totalorder %v1741_v37, 214748365  ;;  %v1743_v32 = vshrl.u32 %v1679_v8, 1  ;;  %2185 = vrcp.f32 %v556_v6  ;;  %v1425_v31 = vshrl.u32 %v1361_v54, 13  ;;  %v2176_v36 = vpop.eup %2175  ;;  %v3947_v44 = vld [vmem:[#allocation47_spill] sm:$0xff] }
 0x196   :  { %v833_v47 = vmul.f32 %v3937_v53, %v769_v46  ;;  %v1234_v41 = vshrl.u32 %v1170_v39, 16  ;;  %v1171_v43 = vxor.u32 %v2624_v45, %v1104_v10  ;;  %v910_v38 = vadd.s32 328, %v2604_v15  ;;  %v2178_v25 = vpop.eup %2177  ;;  %v3948_v53 = vld [vmem:[#allocation48_spill] sm:$0xff] }
 0x197   :  { %v1864_v33 = vsel %vm3438_vm13, %v832_v29, 0.0  ;;  %v770_v19 = vmul.f32 1.1111112, %v2176_v36  ;;  %v1744_v37 = vshrl.u32 %v1680_v11, 1  ;;  %v1489_v50 = vxor.u32 %v1425_v31, %v1361_v54  ;;  %v568_v36 = vpop.xlane.xlu0 %567 }
 0x198   :  { %1928 = vst [vmem:[#allocation7 + $0xe8] sm:$0xff] %v1864_v33  ;;  %v1865_v34 = vsel %vm3445_vm14, %v833_v47, 0.0  ;;  %v771_v63 = vmul.f32 1.1111112, %v2178_v25  ;;  %vm3497_vm3 = vcmp.ge.s32.totalorder %v1742_v51, 214748365  ;;  %2187 = vrcp.f32 %v558_v27  ;;  %v562_v26 = vpop.xlane.xlu1 %561 }
 0x199   :  { %v1298_v21 = vxor.u32 %v1234_v41, %v1170_v39  ;;  %1929 = vst [vmem:[#allocation7 + $0xf0] sm:$0xff] %v1865_v34  ;;  %v834_v35 = vmul.f32 %v3940_v42, %v770_v19  ;;  %vm3502_vm4 = vcmp.ge.s32.totalorder %v1743_v32, 214748365  ;;  %v1553_v17 = vmul.u32 3266489909, %v1489_v50  ;;  %v2180_v40 = vpop.eup %2179  ;;  %v3958_v41 = vld [vmem:[#allocation54_spill] sm:$0xff] }
 0x19a   :  { %2189 = vrcp.f32 %v560_v5  ;;  %v1235_v56 = vshrl.u32 %v1171_v43, 16  ;;  %v835_v48 = vmul.f32 %v3943_v7, %v771_v63  ;;  %v1041_v24 = vmul.u32 128, %v910_v38  ;;  %v2182_v52 = vpop.eup %2181  ;;  %v3951_v38 = vld [vmem:[#allocation49_spill] sm:$0xff] }
 0x19b   :  { %v1362_v20 = vmul.u32 2246822507, %v1298_v21  ;;  %v911_v28 = vadd.s32 336, %v2604_v15  ;;  %v1866_v60 = vsel %vm3458_vm15, %v834_v35, 0.0  ;;  %v772_v1 = vmul.f32 1.1111112, %v2180_v40 }
 0x19c   :  { %v1617_v61 = vshrl.u32 %v1553_v17, 16  ;;  %v1299_v8 = vxor.u32 %v1235_v56, %v1171_v43  ;;  %1930 = vst [vmem:[#allocation7 + $0xf8] sm:$0xff] %v1866_v60  ;;  %v1867_v9 = vsel %vm3466_vm0, %v835_v48, 0.0  ;;  %v773_v14 = vmul.f32 1.1111112, %v2182_v52  ;;  %v566_v51 = vpop.xlane.xlu1 %565 }
 0x19d   :  { %vm3512_vm5 = vcmp.ge.s32.totalorder %v1744_v37, 214748365  ;;  %v1426_v55 = vshrl.u32 %v1362_v20, 13  ;;  %2191 = vrcp.f32 %v562_v26  ;;  %1931 = vst [vmem:[#allocation7 + $0x100] sm:$0xff] %v1867_v9  ;;  %v836_v62 = vmul.f32 %v3946_v3, %v772_v1  ;;  %v3956_v3 = vld [vmem:[#allocation52_spill] sm:$0xff] }
 0x19e   :  { %v1681_v30 = vxor.u32 %v1617_v61, %v1553_v17  ;;  %v1363_v39 = vmul.u32 2246822507, %v1299_v8  ;;  %2193 = vrcp.f32 %v564_v57  ;;  %v2184_v10 = vpop.eup %2183  ;;  %v837_v18 = vmul.f32 %v3947_v44, %v773_v14  ;;  %v3952_v17 = vld [vmem:[#allocation50_spill] sm:$0xff]  ;;  %v572_v8 = vpop.xlane.xlu0 %571 }
 0x19f   :  { %v1490_v49 = vxor.u32 %v1426_v55, %v1362_v20  ;;  %v1105_v59 = vadd.s32 %v1041_v24, %v2606_v16  ;;  %v1042_v23 = vmul.u32 128, %v911_v28  ;;  %v2186_v6 = vpop.eup %2185  ;;  %v1868_v11 = vsel %vm3478_vm1, %v836_v62, 0.0  ;;  %v3953_v20 = vld [vmem:[#allocation51_spill] sm:$0xff] }
 0x1a0   :  { %v774_v54 = vmul.f32 1.1111112, %v2184_v10  ;;  %v1745_v2 = vshrl.u32 %v1681_v30, 1  ;;  %v1427_v46 = vshrl.u32 %v1363_v39, 13  ;;  %1932 = vst [vmem:[#allocation7 + $0x108] sm:$0xff] %v1868_v11  ;;  %v1869_v4 = vsel %vm3486_vm2, %v837_v18, 0.0  ;;  %v570_v34 = vpop.xlane.xlu1 %569 }
 0x1a1   :  { %v775_v29 = vmul.f32 1.1111112, %v2186_v6  ;;  %v1554_v32 = vmul.u32 3266489909, %v1490_v49  ;;  %v1172_v31 = vxor.u32 %v2624_v45, %v1105_v59  ;;  %1933 = vst [vmem:[#allocation7 + $0x110] sm:$0xff] %v1869_v4  ;;  %2195 = vrcp.f32 %v566_v51  ;;  %v3957_v10 = vld [vmem:[#allocation53_spill] sm:$0xff] }
 0x1a2   :  { %v838_v47 = vmul.f32 %v3948_v53, %v774_v54  ;;  %vm3525_vm6 = vcmp.ge.s32.totalorder %v1745_v2, 214748365  ;;  %v1491_v0 = vxor.u32 %v1427_v46, %v1363_v39  ;;  %v2188_v43 = vpop.eup %2187  ;;  %v1106_v19 = vadd.s32 %v1042_v23, %v2606_v16  ;;  %v576_v53 = vpop.xlane.xlu0 %575 }
 0x1a3   :  { %v839_v25 = vmul.f32 %v3951_v38, %v775_v29  ;;  %v1618_v33 = vshrl.u32 %v1554_v32, 16  ;;  %v1236_v13 = vshrl.u32 %v1172_v31, 16  ;;  %v776_v50 = vmul.f32 1.1111112, %v2188_v43 }
 0x1a4   :  { %v2190_v37 = vpop.eup %2189  ;;  %v1870_v27 = vsel %vm3497_vm3, %v838_v47, 0.0  ;;  %v1555_v5 = vmul.u32 3266489909, %v1491_v0  ;;  %2197 = vrcp.f32 %v568_v36  ;;  %v1173_v7 = vxor.u32 %v2624_v45, %v1106_v19  ;;  %v574_v59 = vpop.xlane.xlu1 %573 }
 0x1a5   :  { %1934 = vst [vmem:[#allocation7 + $0x118] sm:$0xff] %v1870_v27  ;;  %v1871_v63 = vsel %vm3502_vm4, %v839_v25, 0.0  ;;  %v777_v21 = vmul.f32 1.1111112, %v2190_v37  ;;  %v1682_v42 = vxor.u32 %v1618_v33, %v1554_v32  ;;  %v1300_v35 = vxor.u32 %v1236_v13, %v1172_v31 }
 0x1a6   :  { %1935 = vst [vmem:[#allocation7 + $0x120] sm:$0xff] %v1871_v63  ;;  %v840_v56 = vmul.f32 %v3952_v17, %v776_v50  ;;  %v1619_v40 = vshrl.u32 %v1555_v5, 16  ;;  %v912_v58 = vadd.s32 344, %v2604_v15  ;;  %2199 = vrcp.f32 %v570_v34  ;;  %v3959_v50 = vld [vmem:[#allocation10_spill] sm:$0xff] }
 0x1a7   :  { %v2192_v48 = vpop.eup %2191  ;;  %v841_v24 = vmul.f32 %v3953_v20, %v777_v21  ;;  %v1746_v28 = vshrl.u32 %v1682_v42, 1  ;;  %v1364_v52 = vmul.u32 2246822507, %v1300_v35  ;;  %v1237_v26 = vshrl.u32 %v1173_v7, 16  ;;  %v3960_v20 = vld [vmem:[#allocation55_spill] sm:$0xff] }
 0x1a8   :  { %v2194_v60 = vpop.eup %2193  ;;  %v1872_v22 = vsel %vm3512_vm5, %v840_v56, 0.0  ;;  %v778_v1 = vmul.f32 1.1111112, %v2192_v48  ;;  %v1683_v61 = vxor.u32 %v1619_v40, %v1555_v5  ;;  %v1043_v39 = vmul.u32 128, %v912_v58 }
 0x1a9   :  { %1936 = vst [vmem:[#allocation7 + $0x128] sm:$0xff] %v1872_v22  ;;  %v1873_v57 = vsel %vm3525_vm6, %v841_v24, 0.0  ;;  %vm3543_vm7 = vcmp.ge.s32.totalorder %v1746_v28, 214748365  ;;  %v779_v14 = vmul.f32 1.1111112, %v2194_v60  ;;  %v1301_v12 = vxor.u32 %v1237_v26, %v1173_v7 }
 0x1aa   :  { %v1428_v55 = vshrl.u32 %v1364_v52, 13  ;;  %1937 = vst [vmem:[#allocation7 + $0x130] sm:$0xff] %v1873_v57  ;;  %v842_v62 = vmul.f32 %v3956_v3, %v778_v1  ;;  %v1747_v30 = vshrl.u32 %v1683_v61, 1  ;;  %v913_v49 = vadd.s32 352, %v2604_v15  ;;  %v578_v61 = vpop.xlane.xlu1 %577 }
 0x1ab   :  { %v843_v44 = vmul.f32 %v3957_v10, %v779_v14  ;;  %2201 = vrcp.f32 %v572_v8  ;;  %v2196_v23 = vpop.eup %2195  ;;  %v1365_v11 = vmul.u32 2246822507, %v1301_v12  ;;  %v1107_v54 = vadd.s32 %v1043_v39, %v2606_v16  ;;  %v3961_v10 = vld [vmem:[#allocation11_spill] sm:$0xff] }
 0x1ac   :  { %v1492_v18 = vxor.u32 %v1428_v55, %v1364_v52  ;;  %v1874_v6 = vsel %vm3543_vm7, %v842_v62, 0.0  ;;  %vm1811_vm8 = vcmp.ge.s32.totalorder %v1747_v30, 214748365  ;;  %v780_v51 = vmul.f32 1.1111112, %v2196_v23 }
 0x1ad   :  { %1938 = vst [vmem:[#allocation7 + $0x138] sm:$0xff] %v1874_v6  ;;  %v1875_v2 = vsel %vm1811_vm8, %v843_v44, 0.0  ;;  %v1044_v4 = vmul.u32 128, %v913_v49  ;;  %v1429_v32 = vshrl.u32 %v1365_v11, 13  ;;  %v1174_v31 = vxor.u32 %v2624_v45, %v1107_v54 }
 0x1ae   :  { %v1556_v46 = vmul.u32 3266489909, %v1492_v18  ;;  %v2198_v29 = vpop.eup %2197  ;;  %1939 = vst [vmem:[#allocation7 + $0x140] sm:$0xff] %v1875_v2  ;;  %v914_v36 = vadd.s32 360, %v2604_v15  ;;  %2203 = vrcp.f32 %v574_v59  ;;  %v844_v0 = vmul.f32 %v3958_v41, %v780_v51  ;;  %v580_v2 = vpop.xlane.xlu0 %579 }
 0x1af   :  { %v781_v43 = vmul.f32 1.1111112, %v2198_v29  ;;  %v1108_v38 = vadd.s32 %v1044_v4, %v2606_v16  ;;  %v1493_v25 = vxor.u32 %v1429_v32, %v1365_v11  ;;  %v1238_v33 = vshrl.u32 %v1174_v31, 16  ;;  %v3962_v32 = vld [vmem:[#allocation12_spill] sm:$0xff] }
 0x1b0   :  { %v1620_v47 = vshrl.u32 %v1556_v46, 16  ;;  %v1045_v13 = vmul.u32 128, %v914_v36  ;;  %v915_v19 = vadd.s32 368, %v2604_v15  ;;  %v2200_v37 = vpop.eup %2199  ;;  %2205 = vrcp.f32 %v576_v53 }
 0x1b1   :  { %v845_v5 = vmul.f32 %v3959_v50, %v781_v43  ;;  %v1175_v34 = vxor.u32 %v2624_v45, %v1108_v38  ;;  %v1557_v63 = vmul.u32 3266489909, %v1493_v25  ;;  %v1302_v21 = vxor.u32 %v1238_v33, %v1174_v31  ;;  %v582_v25 = vpop.xlane.xlu1 %581 }
 0x1b2   :  { %v1684_v27 = vxor.u32 %v1620_v47, %v1556_v46  ;;  %v782_v42 = vmul.f32 1.1111112, %v2200_v37  ;;  %v1109_v35 = vadd.s32 %v1045_v13, %v2606_v16  ;;  %v1046_v40 = vmul.u32 128, %v915_v19  ;;  %v3963_v19 = vld [vmem:[#allocation13_spill] sm:$0xff] }
 0x1b3   :  { %v1239_v56 = vshrl.u32 %v1175_v34, 16  ;;  %v916_v7 = vadd.s32 376, %v2604_v15  ;;  %v1621_v58 = vshrl.u32 %v1557_v63, 16  ;;  %v1366_v48 = vmul.u32 2246822507, %v1302_v21 }
 0x1b4   :  { %v1748_v17 = vshrl.u32 %v1684_v27, 1  ;;  %v3563_v24 = vmul.f32 %v3960_v20, %v782_v42  ;;  %v1176_v28 = vxor.u32 %v2624_v45, %v1109_v35  ;;  %v1110_v22 = vadd.s32 %v1046_v40, %v2606_v16 }
 0x1b5   :  { %v2202_v52 = vpop.eup %2201  ;;  %v1303_v60 = vxor.u32 %v1239_v56, %v1175_v34  ;;  %v1047_v1 = vmul.u32 128, %v916_v7  ;;  %v1685_v8 = vxor.u32 %v1621_v58, %v1557_v63  ;;  %v1430_v57 = vshrl.u32 %v1366_v48, 13 }
 0x1b6   :  { %vm1812_vm9 = vcmp.ge.s32.totalorder %v1748_v17, 214748365  ;;  %v783_v9 = vmul.f32 1.1111112, %v2202_v52  ;;  %v1240_v55 = vshrl.u32 %v1176_v28, 16  ;;  %v1177_v3 = vxor.u32 %v2624_v45, %v1110_v22 }
 0x1b7   :  { %v1876_v26 = vsel %vm1812_vm9, %v844_v0, 0.0  ;;  %v1367_v14 = vmul.u32 2246822507, %v1303_v60  ;;  %v1111_v62 = vadd.s32 %v1047_v1, %v2606_v16  ;;  %v1749_v12 = vshrl.u32 %v1685_v8, 1 }
 0x1b8   :  { %1940 = vst [vmem:[#allocation7 + $0x148] sm:$0xff] %v1876_v26  ;;  %v2204_v30 = vpop.eup %2203  ;;  %v1494_v39 = vxor.u32 %v1430_v57, %v1366_v48  ;;  %v3570_v44 = vmul.f32 %v3961_v10, %v783_v9  ;;  %2207 = vrcp.f32 %v578_v61  ;;  %v1304_v49 = vxor.u32 %v1240_v55, %v1176_v28  ;;  %v584_v9 = vpop.xlane.xlu0 %583  ;;  %v3964_v55 = vld [vmem:[#allocation14_spill] sm:$0xff] }
 0x1b9   :  { %v1431_v18 = vshrl.u32 %v1367_v14, 13  ;;  %v784_v59 = vmul.f32 1.1111112, %v2204_v30  ;;  %v1241_v23 = vshrl.u32 %v1177_v3, 16  ;;  %vm1813_vm10 = vcmp.ge.s32.totalorder %v1749_v12, 214748365 }
 0x1ba   :  { %v1558_v6 = vmul.u32 3266489909, %v1494_v39  ;;  %v1178_v11 = vxor.u32 %v2624_v45, %v1111_v62  ;;  %v917_v54 = vadd.s32 384, %v2604_v15  ;;  %v2206_v46 = vpop.eup %2205  ;;  %v1877_v51 = vsel %vm1813_vm10, %v845_v5, 0.0 }
 0x1bb   :  { %v1495_v4 = vxor.u32 %v1431_v18, %v1367_v14  ;;  %v1368_v29 = vmul.u32 2246822507, %v1304_v49  ;;  %v3575_v31 = vmul.f32 %v3962_v32, %v784_v59  ;;  %1941 = vst [vmem:[#allocation7 + $0x150] sm:$0xff] %v1877_v51  ;;  %v1305_v53 = vxor.u32 %v1241_v23, %v1177_v3 }
 0x1bc   :  { %v1622_v36 = vshrl.u32 %v1558_v6, 16  ;;  %v785_v47 = vmul.f32 1.1111112, %v2206_v46  ;;  %v1242_v41 = vshrl.u32 %v1178_v11, 16  ;;  %v1048_v38 = vmul.u32 128, %v917_v54 }
 0x1bd   :  { %v1559_v0 = vmul.u32 3266489909, %v1495_v4  ;;  %v1432_v43 = vshrl.u32 %v1368_v29, 13  ;;  %2209 = vrcp.f32 %v580_v2  ;;  %v1369_v13 = vmul.u32 2246822507, %v1305_v53  ;;  %v586_v2 = vpop.xlane.xlu1 %585 }
 0x1be   :  { %v1686_v33 = vxor.u32 %v1622_v36, %v1558_v6  ;;  %v3578_v37 = vmul.f32 %v3963_v19, %v785_v47  ;;  %v1306_v27 = vxor.u32 %v1242_v41, %v1178_v11  ;;  %v1112_v34 = vadd.s32 %v1048_v38, %v2606_v16  ;;  %v3965_v47 = vld [vmem:[#allocation15_spill] sm:$0xff] }
 0x1bf   :  { %v1623_v50 = vshrl.u32 %v1559_v0, 16  ;;  %v1496_v5 = vxor.u32 %v1432_v43, %v1368_v29  ;;  %v918_v63 = vadd.s32 392, %v2604_v15  ;;  %v1433_v42 = vshrl.u32 %v1369_v13, 13 }
 0x1c0   :  { %v1750_v21 = vshrl.u32 %v1686_v33, 1  ;;  %v1370_v35 = vmul.u32 2246822507, %v1306_v27  ;;  %2211 = vrcp.f32 %v582_v25  ;;  %v1179_v40 = vxor.u32 %v2624_v45, %v1112_v34  ;;  %v588_v34 = vpop.xlane.xlu0 %587 }
 0x1c1   :  { %v1687_v17 = vxor.u32 %v1623_v50, %v1559_v0  ;;  %v1560_v56 = vmul.u32 3266489909, %v1496_v5  ;;  %v1049_v7 = vmul.u32 128, %v918_v63  ;;  %v1497_v48 = vxor.u32 %v1433_v42, %v1369_v13  ;;  %v3966_v50 = vld [vmem:[#allocation16_spill] sm:$0xff]  ;;  %v590_v42 = vpop.xlane.xlu1 %589 }
 0x1c2   :  { %v2208_v58 = vpop.eup %2207  ;;  %vm1814_vm11 = vcmp.ge.s32.totalorder %v1750_v21, 214748365  ;;  %v1434_v20 = vshrl.u32 %v1370_v35, 13  ;;  %v919_v28 = vadd.s32 400, %v2604_v15  ;;  %v1243_v8 = vshrl.u32 %v1179_v40, 16 }
 0x1c3   :  { %v1878_v52 = vsel %vm1814_vm11, %v3563_v24, 0.0  ;;  %v1751_v60 = vshrl.u32 %v1687_v17, 1  ;;  %v1624_v22 = vshrl.u32 %v1560_v56, 16  ;;  %v786_v1 = vmul.f32 1.1111112, %v2208_v58 }
 0x1c4   :  { %1942 = vst [vmem:[#allocation7 + $0x158] sm:$0xff] %v1878_v52  ;;  %v1561_v61 = vmul.u32 3266489909, %v1497_v48  ;;  %v1498_v26 = vxor.u32 %v1434_v20, %v1370_v35  ;;  %v1113_v57 = vadd.s32 %v1049_v7, %v2606_v16  ;;  %v1050_v62 = vmul.u32 128, %v919_v28 }
 0x1c5   :  { %vm1815_vm12 = vcmp.ge.s32.totalorder %v1751_v60, 214748365  ;;  %v1688_v14 = vxor.u32 %v1624_v22, %v1560_v56  ;;  %v850_v3 = vmul.f32 %v3964_v55, %v786_v1  ;;  %v1307_v24 = vxor.u32 %v1243_v8, %v1179_v40 }
 0x1c6   :  { %v1879_v30 = vsel %vm1815_vm12, %v3570_v44, 0.0  ;;  %v1625_v12 = vshrl.u32 %v1561_v61, 16  ;;  %v1562_v39 = vmul.u32 3266489909, %v1498_v26  ;;  %v1180_v49 = vxor.u32 %v2624_v45, %v1113_v57 }
 0x1c7   :  { %v2210_v10 = vpop.eup %2209  ;;  %1943 = vst [vmem:[#allocation7 + $0x160] sm:$0xff] %v1879_v30  ;;  %v1752_v18 = vshrl.u32 %v1688_v14, 1  ;;  %v1114_v59 = vadd.s32 %v1050_v62, %v2606_v16  ;;  %2213 = vrcp.f32 %v584_v9  ;;  %v1371_v11 = vmul.u32 2246822507, %v1307_v24  ;;  %v592_v14 = vpop.xlane.xlu0 %591 }
 0x1c8   :  { %v1689_v23 = vxor.u32 %v1625_v12, %v1561_v61  ;;  %v1626_v6 = vshrl.u32 %v1562_v39, 16  ;;  %v787_v54 = vmul.f32 1.1111112, %v2210_v10  ;;  %v1244_v46 = vshrl.u32 %v1180_v49, 16 }
 0x1c9   :  { %vm1816_vm13 = vcmp.ge.s32.totalorder %v1752_v18, 214748365  ;;  %v1181_v44 = vxor.u32 %v2624_v45, %v1114_v59  ;;  %v920_v51 = vadd.s32 408, %v2604_v15  ;;  %v1435_v53 = vshrl.u32 %v1371_v11, 13 }
 0x1ca   :  { %v2212_v4 = vpop.eup %2211  ;;  %v1880_v29 = vsel %vm1816_vm13, %v3575_v31, 0.0  ;;  %v1753_v32 = vshrl.u32 %v1689_v23, 1  ;;  %v1690_v36 = vxor.u32 %v1626_v6, %v1562_v39  ;;  %v851_v41 = vmul.f32 %v3965_v47, %v787_v54 }
 0x1cb   :  { %1944 = vst [vmem:[#allocation7 + $0x168] sm:$0xff] %v1880_v29  ;;  %v1308_v0 = vxor.u32 %v1244_v46, %v1180_v49  ;;  %v788_v43 = vmul.f32 1.1111112, %v2212_v4  ;;  %v1245_v38 = vshrl.u32 %v1181_v44, 16  ;;  %v1499_v33 = vxor.u32 %v1435_v53, %v1371_v11 }
 0x1cc   :  { %vm1817_vm14 = vcmp.ge.s32.totalorder %v1753_v32, 214748365  ;;  %v1754_v25 = vshrl.u32 %v1690_v36, 1  ;;  %v1051_v13 = vmul.u32 128, %v920_v51  ;;  %2215 = vrcp.f32 %v586_v2 }
 0x1cd   :  { %v1881_v19 = vsel %vm1817_vm14, %v3578_v37, 0.0  ;;  %v1372_v27 = vmul.u32 2246822507, %v1308_v0  ;;  %v3596_v5 = vmul.f32 %v3966_v50, %v788_v43  ;;  %v1309_v31 = vxor.u32 %v1245_v38, %v1181_v44 }
 0x1ce   :  { %1945 = vst [vmem:[#allocation7 + $0x170] sm:$0xff] %v1881_v19  ;;  %vm1818_vm15 = vcmp.ge.s32.totalorder %v1754_v25, 214748365  ;;  %v1563_v63 = vmul.u32 3266489909, %v1499_v33  ;;  %v1115_v21 = vadd.s32 %v1051_v13, %v2606_v16  ;;  %v921_v40 = vadd.s32 416, %v2604_v15 }
 0x1cf   :  { %v1882_v35 = vsel %vm1818_vm15, %v850_v3, 0.0  ;;  %v1436_v17 = vshrl.u32 %v1372_v27, 13  ;;  %v1373_v56 = vmul.u32 2246822507, %v1309_v31  ;;  %2217 = vrcp.f32 %v588_v34  ;;  %v3967_v3 = vld [vmem:[#allocation17_spill] sm:$0xff] }
 0x1d0   :  { %1946 = vst [vmem:[#allocation7 + $0x178] sm:$0xff] %v1882_v35  ;;  %v1627_v37 = vshrl.u32 %v1563_v63, 16  ;;  %v1182_v7 = vxor.u32 %v2624_v45, %v1115_v21  ;;  %v922_v58 = vadd.s32 424, %v2604_v15  ;;  %v1052_v52 = vmul.u32 128, %v921_v40 }
 0x1d1   :  { %v2214_v48 = vpop.eup %2213  ;;  %v1500_v20 = vxor.u32 %v1436_v17, %v1372_v27  ;;  %v1437_v28 = vshrl.u32 %v1373_v56, 13  ;;  %2219 = vrcp.f32 %v590_v42  ;;  %v923_v9 = vadd.s32 432, %v2604_v15  ;;  %v594_v42 = vpop.xlane.xlu1 %593 }
 0x1d2   :  { %v1691_v60 = vxor.u32 %v1627_v37, %v1563_v63  ;;  %v789_v22 = vmul.f32 1.1111112, %v2214_v48  ;;  %v1246_v1 = vshrl.u32 %v1182_v7, 16  ;;  %v1053_v61 = vmul.u32 128, %v922_v58 }
 0x1d3   :  { %v1564_v26 = vmul.u32 3266489909, %v1500_v20  ;;  %v1501_v8 = vxor.u32 %v1437_v28, %v1373_v56  ;;  %v1116_v57 = vadd.s32 %v1052_v52, %v2606_v16  ;;  %v1054_v18 = vmul.u32 128, %v923_v9  ;;  %v3968_v56 = vld [vmem:[#allocation18_spill] sm:$0xff]  ;;  %v596_v20 = vpop.xlane.xlu0 %595 }
 0x1d4   :  { %v1755_v55 = vshrl.u32 %v1691_v60, 1  ;;  %v853_v62 = vmul.f32 %v3967_v3, %v789_v22  ;;  %v1310_v30 = vxor.u32 %v1246_v1, %v1182_v7  ;;  %v1117_v12 = vadd.s32 %v1053_v61, %v2606_v16  ;;  %v3969_v60 = vld [vmem:[#allocation19_spill] sm:$0xff] }
 0x1d5   :  { %v1628_v39 = vshrl.u32 %v1564_v26, 16  ;;  %v1565_v24 = vmul.u32 3266489909, %v1501_v8  ;;  %v1183_v10 = vxor.u32 %v2624_v45, %v1116_v57  ;;  %2221 = vrcp.f32 %v592_v14  ;;  %v3970_v8 = vld [vmem:[#allocation20_spill] sm:$0xff] }
 0x1d6   :  { %vm1819_vm0 = vcmp.ge.s32.totalorder %v1755_v55, 214748365  ;;  %v1374_v49 = vmul.u32 2246822507, %v1310_v30  ;;  %v1184_v59 = vxor.u32 %v2624_v45, %v1117_v12  ;;  %v2216_v2 = vpop.eup %2215  ;;  %v1118_v51 = vadd.s32 %v1054_v18, %v2606_v16 }
 0x1d7   :  { %v1883_v23 = vsel %vm1819_vm0, %v851_v41, 0.0  ;;  %v1692_v6 = vxor.u32 %v1628_v39, %v1564_v26  ;;  %v1629_v11 = vshrl.u32 %v1565_v24, 16  ;;  %v1247_v54 = vshrl.u32 %v1183_v10, 16 }
 0x1d8   :  { %1947 = vst [vmem:[#allocation7 + $0x180] sm:$0xff] %v1883_v23  ;;  %v1438_v46 = vshrl.u32 %v1374_v49, 13  ;;  %v1248_v44 = vshrl.u32 %v1184_v59, 16  ;;  %v924_v4 = vadd.s32 440, %v2604_v15  ;;  %v790_v36 = vmul.f32 1.1111112, %v2216_v2 }
 0x1d9   :  { %v1756_v29 = vshrl.u32 %v1692_v6, 1  ;;  %v1693_v32 = vxor.u32 %v1629_v11, %v1565_v24  ;;  %v1311_v53 = vxor.u32 %v1247_v54, %v1183_v10  ;;  %v2218_v47 = vpop.eup %2217  ;;  %v1185_v41 = vxor.u32 %v2624_v45, %v1118_v51  ;;  %v598_v24 = vpop.xlane.xlu1 %597 }
 0x1da   :  { %v1502_v0 = vxor.u32 %v1438_v46, %v1374_v49  ;;  %v1312_v43 = vxor.u32 %v1248_v44, %v1184_v59  ;;  %v1055_v38 = vmul.u32 128, %v924_v4  ;;  %v791_v50 = vmul.f32 1.1111112, %v2218_v47  ;;  %v600_v54 = vpop.xlane.xlu0 %599 }
 0x1db   :  { %v2220_v25 = vpop.eup %2219  ;;  %vm1820_vm1 = vcmp.ge.s32.totalorder %v1756_v29, 214748365  ;;  %v1757_v33 = vshrl.u32 %v1693_v32, 1  ;;  %v1375_v13 = vmul.u32 2246822507, %v1311_v53  ;;  %v1249_v31 = vshrl.u32 %v1185_v41, 16 }
 0x1dc   :  { %v1884_v19 = vsel %vm1820_vm1, %v3596_v5, 0.0  ;;  %v1566_v27 = vmul.u32 3266489909, %v1502_v0  ;;  %v1376_v63 = vmul.u32 2246822507, %v1312_v43  ;;  %v1119_v21 = vadd.s32 %v1055_v38, %v2606_v16 }
 0x1dd   :  { %1948 = vst [vmem:[#allocation7 + $0x188] sm:$0xff] %v1884_v19  ;;  %vm1821_vm2 = vcmp.ge.s32.totalorder %v1757_v33, 214748365  ;;  %v1439_v34 = vshrl.u32 %v1375_v13, 13  ;;  %v854_v40 = vmul.f32 %v3968_v56, %v790_v36  ;;  %v792_v37 = vmul.f32 1.1111112, %v2220_v25 }
 0x1de   :  { %v1885_v35 = vsel %vm1821_vm2, %v853_v62, 0.0  ;;  %v1630_v17 = vshrl.u32 %v1566_v27, 16  ;;  %v1440_v58 = vshrl.u32 %v1376_v63, 13  ;;  %v1313_v48 = vxor.u32 %v1249_v31, %v1185_v41 }
 0x1df   :  { %1949 = vst [vmem:[#allocation7 + $0x190] sm:$0xff] %v1885_v35  ;;  %v1503_v7 = vxor.u32 %v1439_v34, %v1375_v13  ;;  %v1186_v5 = vxor.u32 %v2624_v45, %v1119_v21  ;;  %v2222_v28 = vpop.eup %2221  ;;  %v855_v22 = vmul.f32 %v3969_v60, %v791_v50  ;;  %2223 = vrcp.f32 %v594_v42  ;;  %v3971_v50 = vld [vmem:[#allocation21_spill] sm:$0xff] }
 0x1e0   :  { %v1694_v52 = vxor.u32 %v1630_v17, %v1566_v27  ;;  %v925_v1 = vadd.s32 448, %v2604_v15  ;;  %v1504_v26 = vxor.u32 %v1440_v58, %v1376_v63  ;;  %v856_v57 = vmul.f32 %v3970_v8, %v792_v37  ;;  %v3972_v8 = vld [vmem:[#allocation22_spill] sm:$0xff] }
 0x1e1   :  { %v1567_v61 = vmul.u32 3266489909, %v1503_v7  ;;  %v1377_v9 = vmul.u32 2246822507, %v1313_v48  ;;  %v1250_v55 = vshrl.u32 %v1186_v5, 16  ;;  %2225 = vrcp.f32 %v596_v20 }
 0x1e2   :  { %v1758_v14 = vshrl.u32 %v1694_v52, 1  ;;  %v1056_v3 = vmul.u32 128, %v925_v1  ;;  %v1568_v30 = vmul.u32 3266489909, %v1504_v26  ;;  %v793_v39 = vmul.f32 1.1111112, %v2222_v28  ;;  %v602_v26 = vpop.xlane.xlu1 %601 }
 0x1e3   :  { %v1631_v62 = vshrl.u32 %v1567_v61, 16  ;;  %v1441_v12 = vshrl.u32 %v1377_v9, 13  ;;  %v1314_v10 = vxor.u32 %v1250_v55, %v1186_v5  ;;  %v926_v49 = vadd.s32 456, %v2604_v15 }
 0x1e4   :  { %vm1822_vm3 = vcmp.ge.s32.totalorder %v1758_v14, 214748365  ;;  %v1120_v18 = vadd.s32 %v1056_v3, %v2606_v16  ;;  %v1632_v6 = vshrl.u32 %v1568_v30, 16  ;;  %2227 = vrcp.f32 %v598_v24 }
 0x1e5   :  { %v1886_v59 = vsel %vm1822_vm3, %v854_v40, 0.0  ;;  %v1695_v23 = vxor.u32 %v1631_v62, %v1567_v61  ;;  %v1505_v11 = vxor.u32 %v1441_v12, %v1377_v9  ;;  %v1378_v2 = vmul.u32 2246822507, %v1314_v10  ;;  %v3973_v12 = vld [vmem:[#allocation23_spill] sm:$0xff]  ;;  %v604_v10 = vpop.xlane.xlu0 %603 }
 0x1e6   :  { %1950 = vst [vmem:[#allocation7 + $0x198] sm:$0xff] %v1886_v59  ;;  %v1187_v46 = vxor.u32 %v2624_v45, %v1120_v18  ;;  %v1057_v44 = vmul.u32 128, %v926_v49  ;;  %v1696_v4 = vxor.u32 %v1632_v6, %v1568_v30  ;;  %v927_v32 = vadd.s32 464, %v2604_v15 }
 0x1e7   :  { %v1759_v51 = vshrl.u32 %v1695_v23, 1  ;;  %v1569_v29 = vmul.u32 3266489909, %v1505_v11  ;;  %v1442_v36 = vshrl.u32 %v1378_v2, 13  ;;  %2229 = vrcp.f32 %v600_v54 }
 0x1e8   :  { %v1251_v53 = vshrl.u32 %v1187_v46, 16  ;;  %v1121_v47 = vadd.s32 %v1057_v44, %v2606_v16  ;;  %v1760_v0 = vshrl.u32 %v1696_v4, 1  ;;  %v1058_v41 = vmul.u32 128, %v927_v32 }
 0x1e9   :  { %vm1823_vm4 = vcmp.ge.s32.totalorder %v1759_v51, 214748365  ;;  %v1633_v43 = vshrl.u32 %v1569_v29, 16  ;;  %v2224_v38 = vpop.eup %2223  ;;  %v1506_v33 = vxor.u32 %v1442_v36, %v1378_v2  ;;  %v857_v31 = vmul.f32 %v3971_v50, %v793_v39 }
 0x1ea   :  { %v1887_v25 = vsel %vm1823_vm4, %v855_v22, 0.0  ;;  %v1315_v13 = vxor.u32 %v1251_v53, %v1187_v46  ;;  %v1188_v19 = vxor.u32 %v2624_v45, %v1121_v47  ;;  %vm1824_vm5 = vcmp.ge.s32.totalorder %v1760_v0, 214748365 }
 0x1eb   :  { %1951 = vst [vmem:[#allocation7 + $0x1a0] sm:$0xff] %v1887_v25  ;;  %v1697_v27 = vxor.u32 %v1633_v43, %v1569_v29  ;;  %v1122_v34 = vadd.s32 %v1058_v41, %v2606_v16  ;;  %v2226_v63 = vpop.eup %2225  ;;  %v1888_v21 = vsel %vm1824_vm5, %v856_v57, 0.0  ;;  %v1570_v42 = vmul.u32 3266489909, %v1506_v33 }
 0x1ec   :  { %v1379_v35 = vmul.u32 2246822507, %v1315_v13  ;;  %v1252_v17 = vshrl.u32 %v1188_v19, 16  ;;  %1952 = vst [vmem:[#allocation7 + $0x1a8] sm:$0xff] %v1888_v21  ;;  %v794_v40 = vmul.f32 1.1111112, %v2224_v38  ;;  %2231 = vrcp.f32 %v602_v26 }
 0x1ed   :  { %v1761_v56 = vshrl.u32 %v1697_v27, 1  ;;  %v795_v37 = vmul.f32 1.1111112, %v2226_v63  ;;  %v1189_v7 = vxor.u32 %v2624_v45, %v1122_v34  ;;  %v1634_v58 = vshrl.u32 %v1570_v42, 16  ;;  %v3974_v27 = vld [vmem:[#allocation24_spill] sm:$0xff]  ;;  %v606_v34 = vpop.xlane.xlu1 %605 }
 0x1ee   :  { %v1443_v48 = vshrl.u32 %v1379_v35, 13  ;;  %v1316_v5 = vxor.u32 %v1252_v17, %v1188_v19  ;;  %v928_v20 = vadd.s32 472, %v2604_v15  ;;  %v2228_v52 = vpop.eup %2227  ;;  %v858_v57 = vmul.f32 %v3972_v8, %v794_v40 }
 0x1ef   :  { %vm1825_vm6 = vcmp.ge.s32.totalorder %v1761_v56, 214748365  ;;  %v1253_v28 = vshrl.u32 %v1189_v7, 16  ;;  %v1698_v22 = vxor.u32 %v1634_v58, %v1570_v42  ;;  %v929_v55 = vadd.s32 480, %v2604_v15  ;;  %v3975_v56 = vld [vmem:[#allocation56_spill] sm:$0xff]  ;;  %v608_v58 = vpop.xlane.xlu0 %607 }
 0x1f0   :  { %v1889_v60 = vsel %vm1825_vm6, %v857_v31, 0.0  ;;  %v1507_v1 = vxor.u32 %v1443_v48, %v1379_v35  ;;  %v1380_v61 = vmul.u32 2246822507, %v1316_v5  ;;  %v1059_v14 = vmul.u32 128, %v928_v20 }
 0x1f1   :  { %1953 = vst [vmem:[#allocation7 + $0x1b0] sm:$0xff] %v1889_v60  ;;  %v1317_v9 = vxor.u32 %v1253_v28, %v1189_v7  ;;  %v2230_v3 = vpop.eup %2229  ;;  %v1762_v62 = vshrl.u32 %v1698_v22, 1  ;;  %v859_v39 = vmul.f32 %v3973_v12, %v795_v37  ;;  %v796_v18 = vmul.f32 1.1111112, %v2228_v52 }
 0x1f2   :  { %v1571_v30 = vmul.u32 3266489909, %v1507_v1  ;;  %v1444_v24 = vshrl.u32 %v1380_v61, 13  ;;  %v1123_v59 = vadd.s32 %v1059_v14, %v2606_v16  ;;  %v1060_v11 = vmul.u32 128, %v929_v55 }
 0x1f3   :  { %v1381_v49 = vmul.u32 2246822507, %v1317_v9  ;;  %vm1826_vm7 = vcmp.ge.s32.totalorder %v1762_v62, 214748365  ;;  %2233 = vrcp.f32 %v604_v10  ;;  %v930_v29 = vadd.s32 488, %v2604_v15 }
 0x1f4   :  { %v1635_v23 = vshrl.u32 %v1571_v30, 16  ;;  %v1508_v6 = vxor.u32 %v1444_v24, %v1380_v61  ;;  %v1890_v54 = vsel %vm1826_vm7, %v858_v57, 0.0  ;;  %v1190_v46 = vxor.u32 %v2624_v45, %v1123_v59  ;;  %v610_v24 = vpop.xlane.xlu1 %609 }
 0x1f5   :  { %v1445_v2 = vshrl.u32 %v1381_v49, 13  ;;  %1954 = vst [vmem:[#allocation7 + $0x1b8] sm:$0xff] %v1890_v54  ;;  %v1124_v4 = vadd.s32 %v1060_v11, %v2606_v16  ;;  %v797_v36 = vmul.f32 1.1111112, %v2230_v3  ;;  %v931_v47 = vadd.s32 496, %v2604_v15 }
 0x1f6   :  { %v1699_v44 = vxor.u32 %v1635_v23, %v1571_v30  ;;  %v1572_v51 = vmul.u32 3266489909, %v1508_v6  ;;  %v1254_v53 = vshrl.u32 %v1190_v46, 16  ;;  %v1061_v38 = vmul.u32 128, %v930_v29  ;;  %v2232_v48 = vpop.eup %2231 }
 0x1f7   :  { %v1509_v32 = vxor.u32 %v1445_v2, %v1381_v49  ;;  %v1191_v41 = vxor.u32 %v2624_v45, %v1124_v4  ;;  %v1062_v13 = vmul.u32 128, %v931_v47  ;;  %v860_v50 = vmul.f32 %v3974_v27, %v796_v18  ;;  %v3976_v2 = vld [vmem:[#allocation57_spill] sm:$0xff] }
 0x1f8   :  { %v1763_v0 = vshrl.u32 %v1699_v44, 1  ;;  %v1636_v43 = vshrl.u32 %v1572_v51, 16  ;;  %v1318_v33 = vxor.u32 %v1254_v53, %v1190_v46  ;;  %v1125_v35 = vadd.s32 %v1061_v38, %v2606_v16 }
 0x1f9   :  { %v1573_v25 = vmul.u32 3266489909, %v1509_v32  ;;  %v1255_v31 = vshrl.u32 %v1191_v41, 16  ;;  %v861_v40 = vmul.f32 %v3975_v56, %v797_v36  ;;  %v1126_v7 = vadd.s32 %v1062_v13, %v2606_v16 }
 0x1fa   :  { %vm1827_vm8 = vcmp.ge.s32.totalorder %v1763_v0, 214748365  ;;  %v1700_v19 = vxor.u32 %v1636_v43, %v1572_v51  ;;  %v1382_v42 = vmul.u32 2246822507, %v1318_v33  ;;  %v1192_v28 = vxor.u32 %v2624_v45, %v1125_v35 }
 0x1fb   :  { %v1891_v63 = vsel %vm1827_vm8, %v859_v39, 0.0  ;;  %v1637_v21 = vshrl.u32 %v1573_v25, 16  ;;  %v1319_v37 = vxor.u32 %v1255_v31, %v1191_v41  ;;  %2235 = vrcp.f32 %v606_v34 }
 0x1fc   :  { %1955 = vst [vmem:[#allocation7 + $0x1c0] sm:$0xff] %v1891_v63  ;;  %v1764_v17 = vshrl.u32 %v1700_v19, 1  ;;  %v1446_v20 = vshrl.u32 %v1382_v42, 13  ;;  %v1193_v60 = vxor.u32 %v2624_v45, %v1126_v7  ;;  %v932_v22 = vadd.s32 504, %v2604_v15 }
 0x1fd   :  { %v1701_v5 = vxor.u32 %v1637_v21, %v1573_v25  ;;  %v1383_v52 = vmul.u32 2246822507, %v1319_v37  ;;  %v2234_v1 = vpop.eup %2233  ;;  %2237 = vrcp.f32 %v608_v58  ;;  %v1256_v9 = vshrl.u32 %v1192_v28, 16  ;;  %v3979_v58 = vld [vmem:[#allocation60_spill] sm:$0xff] }
 0x1fe   :  { %vm1828_vm9 = vcmp.ge.s32.totalorder %v1764_v17, 214748365  ;;  %v1510_v8 = vxor.u32 %v1446_v20, %v1382_v42  ;;  %v1257_v14 = vshrl.u32 %v1193_v60, 16  ;;  %v1063_v55 = vmul.u32 128, %v932_v22  ;;  %v3978_v17 = vld [vmem:[#allocation59_spill] sm:$0xff] }
 0x1ff   :  { %v1892_v61 = vsel %vm1828_vm9, %v860_v50, 0.0  ;;  %v1765_v26 = vshrl.u32 %v1701_v5, 1  ;;  %v1447_v57 = vshrl.u32 %v1383_v52, 13  ;;  %v798_v30 = vmul.f32 1.1111112, %v2232_v48 }
 0x200   :  { %1956 = vst [vmem:[#allocation7 + $0x1c8] sm:$0xff] %v1892_v61  ;;  %v1574_v3 = vmul.u32 3266489909, %v1510_v8  ;;  %v1320_v39 = vxor.u32 %v1256_v9, %v1192_v28  ;;  %v1321_v15 = vxor.u32 %v1257_v14, %v1193_v60  ;;  %v1127_v18 = vadd.s32 %v1063_v55, %v2606_v16  ;;  %v3977_v16 = vld [vmem:[#allocation58_spill] sm:$0xff]  ;;  %v3980_v61 = vld [vmem:[#allocation61_spill] sm:$0xff] }
 0x201   :  { %vm1829_vm10 = vcmp.ge.s32.totalorder %v1765_v26, 214748365  ;;  %v1511_v12 = vxor.u32 %v1447_v57, %v1383_v52  ;;  %v799_v59 = vmul.f32 1.1111112, %v2234_v1  ;;  %2239 = vrcp.f32 %v610_v24 }
 0x202   :  { %v1893_v62 = vsel %vm1829_vm10, %v861_v40, 0.0  ;;  %v1638_v10 = vshrl.u32 %v1574_v3, 16  ;;  %v1384_v23 = vmul.u32 2246822507, %v1320_v39  ;;  %v1385_v11 = vmul.u32 2246822507, %v1321_v15 }
 0x203   :  { %1957 = vst [vmem:[#allocation7 + $0x1d0] sm:$0xff] %v1893_v62  ;;  %v1575_v49 = vmul.u32 3266489909, %v1511_v12  ;;  %v1194_v54 = vxor.u32 %v2624_v45, %v1127_v18  ;;  %v862_v46 = vmul.f32 %v3976_v2, %v798_v30  ;;  %v863_v43 = vmul.f32 %v3977_v16, %v799_v59 }
 0x204   :  { %v1702_v6 = vxor.u32 %v1638_v10, %v1574_v3  ;;  %v1448_v51 = vshrl.u32 %v1384_v23, 13  ;;  %v1449_v32 = vshrl.u32 %v1385_v11, 13 }
 0x205   :  { %v1639_v44 = vshrl.u32 %v1575_v49, 16  ;;  %v2236_v4 = vpop.eup %2235  ;;  %v1258_v36 = vshrl.u32 %v1194_v54, 16 }
 0x206   :  { %v1766_v29 = vshrl.u32 %v1702_v6, 1  ;;  %v1512_v47 = vxor.u32 %v1448_v51, %v1384_v23  ;;  %v1513_v41 = vxor.u32 %v1449_v32, %v1385_v11  ;;  %v800_v13 = vmul.f32 1.1111112, %v2236_v4 }
 0x207   :  { %v1703_v53 = vxor.u32 %v1639_v44, %v1575_v49  ;;  %v2238_v0 = vpop.eup %2237  ;;  %v1322_v38 = vxor.u32 %v1258_v36, %v1194_v54 }
 0x208   :  { %vm1830_vm11 = vcmp.ge.s32.totalorder %v1766_v29, 214748365  ;;  %v1576_v45 = vmul.u32 3266489909, %v1512_v47  ;;  %v1577_v19 = vmul.u32 3266489909, %v1513_v41  ;;  %v864_v56 = vmul.f32 %v3978_v17, %v800_v13 }
 0x209   :  { %v1894_v25 = vsel %vm1830_vm11, %v862_v46, 0.0  ;;  %v1767_v33 = vshrl.u32 %v1703_v53, 1  ;;  %v1386_v27 = vmul.u32 2246822507, %v1322_v38  ;;  %v801_v31 = vmul.f32 1.1111112, %v2238_v0 }
 0x20a   :  { %1958 = vst [vmem:[#allocation7 + $0x1d8] sm:$0xff] %v1894_v25  ;;  %v1640_v50 = vshrl.u32 %v1576_v45, 16  ;;  %v1641_v63 = vshrl.u32 %v1577_v19, 16 }
 0x20b   :  { %vm1831_vm12 = vcmp.ge.s32.totalorder %v1767_v33, 214748365  ;;  %v1450_v21 = vshrl.u32 %v1386_v27, 13  ;;  %v2240_v35 = vpop.eup %2239  ;;  %v865_v48 = vmul.f32 %v3979_v58, %v801_v31 }
 0x20c   :  { %v1895_v34 = vsel %vm1831_vm12, %v863_v43, 0.0  ;;  %v1704_v42 = vxor.u32 %v1640_v50, %v1576_v45  ;;  %v1705_v40 = vxor.u32 %v1641_v63, %v1577_v19  ;;  %v802_v28 = vmul.f32 1.1111112, %v2240_v35 }
 0x20d   :  { %1959 = vst [vmem:[#allocation7 + $0x1e0] sm:$0xff] %v1895_v34  ;;  %v1514_v37 = vxor.u32 %v1450_v21, %v1386_v27 }
 0x20e   :  { %v1768_v7 = vshrl.u32 %v1704_v42, 1  ;;  %v1769_v5 = vshrl.u32 %v1705_v40, 1  ;;  %v866_v26 = vmul.f32 %v3980_v61, %v802_v28 }
 0x20f   :  { %v1578_v20 = vmul.u32 3266489909, %v1514_v37 }
 0x210   :  { %vm1832_vm13 = vcmp.ge.s32.totalorder %v1768_v7, 214748365  ;;  %vm1833_vm14 = vcmp.ge.s32.totalorder %v1769_v5, 214748365 }
 0x211   :  { %v1896_v52 = vsel %vm1832_vm13, %v864_v56, 0.0  ;;  %v1642_v60 = vshrl.u32 %v1578_v20, 16  ;;  %v1897_v22 = vsel %vm1833_vm14, %v865_v48, 0.0 }
 0x212   :  { %1960 = vst [vmem:[#allocation7 + $0x1e8] sm:$0xff] %v1896_v52  ;;  %1961 = vst [vmem:[#allocation7 + $0x1f0] sm:$0xff] %v1897_v22 }
 0x213   :  { %v1706_v1 = vxor.u32 %v1642_v60, %v1578_v20 }
 0x215   :  { %v1770_v8 = vshrl.u32 %v1706_v1, 1 }
 0x217   :  { %vm1834_vm15 = vcmp.ge.s32.totalorder %v1770_v8, 214748365 }
 0x218   :  { %v1898_v57 = vsel %vm1834_vm15, %v866_v26, 0.0 }
 0x219   :  { %1962 = vst [vmem:[#allocation7 + $0x1f8] sm:$0xff] %v1898_v57 }
 0x21a   :  { %2274 = shalt.err (!%p2271_p12)
}
 0x21b   :  { %s2275_s6 = scalar_lea.hbm %s3669_s3, 8192 }
 0x21c   :  { %p2276_p13 = scmp.ne.s32.totalorder %s3669_s3, %s2275_s6  ;;  %p2279_p0 = scmp.lt.u32.totalorder %s2275_s6, %s3669_s3 }
 0x21e   :  { %p2281_p1 = pnand %p2279_p0, %p2276_p13 }
 0x220   :  { %2284 = shalt.err (!%p2281_p1)
}
 0x221   :  { %1974 = dma.vmem_to_hbm [thread:$0]  %s1969_s29, 8192, %s3669_s3, [#allocation6], %s2290_s22, %s2290_s22, %s2291_s23  }
 0x222   :  { %2287 = dma.done.wait [#allocation6], 8192  }
 0x223   :  { %2288 = vsyncadd [#allocation6], 4294959104 }
 0x224   :  { %1978 = vsyncpa [#allocation5], 1 }
 0x225   :  { %1979 = vsyncpa [#allocation6], 1 }

</bundles_post_ra>
